<compile_context>
chip_gen: v6e
topology: v6e:2x2x1
jax: 0.10.0
libtpu: 0.0.40
codegen_flags: <defaults>
</compile_context>

<pallas_src>
import jax
import jax.numpy as jnp
from jax import lax
from jax.experimental import pallas as pl
from jax.experimental.pallas import tpu as pltpu

_PREC = lax.Precision.HIGHEST     # true-f32 MXU contraction (parity with f32 PyTorch)
_LANE = 128                       # TPU lane width
_SUBLANE = 8                      # TPU sublane tile
_TARGET_M_ROWS = 256              # aim to fill the 256-row MXU on v6e/v7x


def _round_up(x, m):
    return (x + m - 1) // m * m


def _cdiv(a, b):
    return (a + b - 1) // b


def _pick_batch_chunk(n, hp, override):
    if override is not None:
        return max(1, min(int(override), n))
    bc = max(1, min(n, _TARGET_M_ROWS // hp))   # fill the MXU M dimension
    if n >= 2 and n < 2 * bc:
        bc = (n + 1) // 2                       # keep >=2 grid steps so v7x's 2nd TC gets work
    return bc


def _double_conv_kernel(x_ref, m1_ref, b1_ref, m2_ref, b2_ref, o_ref):
    """Fused conv1+ReLU -> conv2+ReLU on a chunk of images stacked as one tall row-image.

    x_ref : (R, W*Cin)       R = bc*Hp merged input rows, (width, channel) on lanes
    m1_ref: (KH, W*Cin, P1)  block-banded conv1 weight, lane-padded to P1 (pad cols zero)
    b1_ref: (1, P1)          conv1 bias tiled per output column (pad lanes zero)
    m2_ref: (KH, P1, P2)     block-banded conv2 weight (padded K rows / cols zero)
    b2_ref: (1, P2)
    o_ref : (R, P2)          merged conv2 rows; wrapper extracts per-image valid rows
    """
    KH = m1_ref.shape[0]
    R = x_ref.shape[0]
    M1 = R - (KH - 1)          # conv1 merged output rows
    M2 = R - 2 * (KH - 1)      # conv2 merged output rows
    P2 = o_ref.shape[1]

    x = x_ref[...]             # (R, W*Cin)

    # ---- conv1 + ReLU: KH matmuls, M = M1 (intermediate never leaves the chip) ----
    acc1 = jnp.dot(x[0:M1, :], m1_ref[0],
                   preferred_element_type=jnp.float32, precision=_PREC)
    for kh in range(1, KH):    # static unroll
        acc1 = acc1 + jnp.dot(x[kh:kh + M1, :], m1_ref[kh],
                              preferred_element_type=jnp.float32, precision=_PREC)
    y1 = jnp.maximum(acc1 + b1_ref[...], 0.0)        # (M1, P1); padded lanes stay 0

    # ---- conv2 + ReLU ----
    acc2 = jnp.dot(y1[0:M2, :], m2_ref[0],
                   preferred_element_type=jnp.float32, precision=_PREC)
    for kh in range(1, KH):
        acc2 = acc2 + jnp.dot(y1[kh:kh + M2, :], m2_ref[kh],
                              preferred_element_type=jnp.float32, precision=_PREC)
    y2 = jnp.maximum(acc2 + b2_ref[...], 0.0)        # (M2, P2)

    o_ref[0:M2, :] = y2.astype(o_ref.dtype)
    if M2 < R:                                       # deterministic tail; never read back
        o_ref[M2:R, :] = jnp.zeros((R - M2, P2), o_ref.dtype)


def _banded_weight(w_hwio, w_in, pad_k_to=None, pad_n_to=None):
    """HWIO conv weight (KH, KW, Cin, Cout) -> KH block-banded slabs
    (KH, K, N) with K = w_in*Cin (optionally zero-padded to pad_k_to) and
    N = Wo*Cout (optionally zero-padded to pad_n_to), such that
    sum_kh rows[kh:kh+Ho, :] @ M[kh] equals a VALID stride-1 convolution in
    (row, width*channel) layout."""
    KH, KW, Cin, Cout = w_hwio.shape
    Wo = w_in - KW + 1
    w_idx = jnp.arange(w_in)[:, None]            # absolute input column w
    wo_idx = jnp.arange(Wo)[None, :]             # output column wo
    kw_rel = w_idx - wo_idx                      # (w_in, Wo): tap index w - wo
    valid = (kw_rel >= 0) & (kw_rel < KW)
    kw_cl = jnp.clip(kw_rel, 0, KW - 1)
    taps = w_hwio[:, kw_cl, :, :]                # (KH, w_in, Wo, Cin, Cout)
    taps = taps * valid[None, :, :, None, None].astype(w_hwio.dtype)
    taps = jnp.transpose(taps, (0, 1, 3, 2, 4))  # (KH, w_in, Cin, Wo, Cout)
    m = taps.reshape(KH, w_in * Cin, Wo * Cout)
    pad_k = (pad_k_to or m.shape[1]) - m.shape[1]
    pad_n = (pad_n_to or m.shape[2]) - m.shape[2]
    if pad_k or pad_n:
        m = jnp.pad(m, ((0, 0), (0, pad_k), (0, pad_n)))
    return m


def make_double_conv(w1_oihw, b1, w2_oihw, b2, H, W, *, batch_chunk=None):
    """Prepare the banded weight slabs ONCE ("module init") and return a jitted
    forward fn: x (N, Cin, H, W) NCHW -> relu(conv2(relu(conv1(x)))) in NCHW.
    Weights are in PyTorch nn.Conv2d layout (Cout, Cin, KH, KW); VALID conv, stride 1."""
    w1 = jnp.transpose(jnp.asarray(w1_oihw, jnp.float32), (2, 3, 1, 0))  # OIHW -> HWIO
    w2 = jnp.transpose(jnp.asarray(w2_oihw, jnp.float32), (2, 3, 1, 0))
    KH, KW, Cin, Cout1 = w1.shape
    Cout2 = w2.shape[-1]
    Ho1, Wo1 = H - KH + 1, W - KW + 1
    Ho2, Wo2 = Ho1 - KH + 1, Wo1 - KW + 1
    assert Ho2 >= 1 and Wo2 >= 1, "image too small for two valid convs"

    n1, n2 = Wo1 * Cout1, Wo2 * Cout2
    P1, P2 = _round_up(n1, _LANE), _round_up(n2, _LANE)   # lane-dense (unmasked) stores
    WC = W * Cin
    Hp = _round_up(H, _SUBLANE)                           # sublane-aligned per-image rows

    # ---- hoisted: runs once at "module init", reused on every forward call ----
    m1 = _banded_weight(w1, W, pad_n_to=P1)               # (KH, W*Cin, P1)
    m2 = _banded_weight(w2, Wo1, pad_k_to=P1, pad_n_to=P2)  # (KH, P1, P2), pads are zero
    b1r = jnp.pad(jnp.tile(jnp.asarray(b1, jnp.float32), Wo1), (0, P1 - n1))[None, :]
    b2r = jnp.pad(jnp.tile(jnp.asarray(b2, jnp.float32), Wo2), (0, P2 - n2))[None, :]

    def forward(x_nchw):
        N = x_nchw.shape[0]
        assert x_nchw.shape[1:] == (Cin, H, W), x_nchw.shape
        bc = _pick_batch_chunk(N, Hp, batch_chunk)
        n_steps = _cdiv(N, bc)
        Npad = n_steps * bc
        R = bc * Hp                                       # merged rows per grid step

        # NCHW -> per-image (row, width*channel) rows, row-padded to Hp, stacked into a
        # single flat 2-D row-stack so the kernel only needs contiguous static row windows.
        x_rows = jnp.transpose(x_nchw, (0, 2, 3, 1)).reshape(N, H, WC).astype(jnp.float32)
        x_rows = jnp.pad(x_rows, ((0, Npad - N), (0, Hp - H), (0, 0)))
        x_flat = x_rows.reshape(Npad * Hp, WC)

        out_flat = pl.pallas_call(
            _double_conv_kernel,
            out_shape=jax.ShapeDtypeStruct((Npad * Hp, P2), x_nchw.dtype),
            grid_spec=pltpu.PrefetchScalarGridSpec(
                num_scalar_prefetch=0,
                grid=(n_steps,),
                in_specs=[
                    pl.BlockSpec((R, WC), lambda g: (g, 0)),
                    # grid-invariant weight/bias slabs: fetched once, reused every step
                    pl.BlockSpec((KH, WC, P1), lambda g: (0, 0, 0)),
                    pl.BlockSpec((1, P1), lambda g: (0, 0)),
                    pl.BlockSpec((KH, P1, P2), lambda g: (0, 0, 0)),
                    pl.BlockSpec((1, P2), lambda g: (0, 0)),
                ],
                out_specs=pl.BlockSpec((R, P2), lambda g: (g, 0)),
            ),
            compiler_params=pltpu.CompilerParams(
                dimension_semantics=("parallel",)),       # chunks shard over v7x's 2 TCs
        )(x_flat, m1, b1r, m2, b2r)

        # merged row b*Hp + r  ==  image b, conv2 output row r  (r < Ho2)
        out = out_flat.reshape(Npad, Hp, P2)[:N, :Ho2, :n2]
        out = out.reshape(N, Ho2, Wo2, Cout2)
        return jnp.transpose(out, (0, 3, 1, 2))           # -> NCHW

    return jax.jit(forward)


def _ref_double_conv(x_nchw, w1_oihw, b1, w2_oihw, b2):
    # Pure-JAX reference (lax conv, same f32 precision) for the correctness check.
    def conv(x, w, b):
        y = lax.conv_general_dilated(
            x, w, window_strides=(1, 1), padding="VALID",
            dimension_numbers=("NCHW", "OIHW", "NCHW"), precision=_PREC)
        return jnp.maximum(y + b[None, :, None, None], 0.0)
    return conv(conv(x_nchw, w1_oihw, b1), w2_oihw, b2)


if __name__ == "__main__":
    key = jax.random.PRNGKey(0)
    N, Cin, Hs, Ws = 2, 4, 16, 16
    Cout, K = 8, 3

    k_x, k_w1, k_b1, k_w2, k_b2 = jax.random.split(key, 5)
    x = jax.random.normal(k_x, (N, Cin, Hs, Ws), jnp.float32)
    # PyTorch nn.Conv2d parameter layout: weight (Cout, Cin, KH, KW), bias (Cout,)
    w1 = jax.random.normal(k_w1, (Cout, Cin, K, K), jnp.float32) * 0.1
    b1 = jax.random.normal(k_b1, (Cout,), jnp.float32) * 0.1
    w2 = jax.random.normal(k_w2, (Cout, Cout, K, K), jnp.float32) * 0.1
    b2 = jax.random.normal(k_b2, (Cout,), jnp.float32) * 0.1

    # Weight-slab preparation is hoisted into make_double_conv (runs once here).
    fwd = make_double_conv(w1, b1, w2, b2, Hs, Ws)
    out = jax.block_until_ready(fwd(x))

    ref = _ref_double_conv(x, w1, b1, w2, b2)
    assert out.shape == (N, Cout, Hs - 4, Ws - 4), out.shape
    assert jnp.allclose(out, ref, atol=1e-4, rtol=1e-4), "mismatch vs reference"

    print("KERNEL_OK")
</pallas_src>

<mosaic_0001>
module attributes {stable_mosaic.version = 11 : i64} {
  func.func @_double_conv_kernel(%arg0: i32, %arg1: memref<16x64xf32, #tpu.memory_space<vmem>>, %arg2: memref<3x64x128xf32, #tpu.memory_space<vmem>>, %arg3: memref<1x128xf32, #tpu.memory_space<vmem>>, %arg4: memref<3x128x128xf32, #tpu.memory_space<vmem>>, %arg5: memref<1x128xf32, #tpu.memory_space<vmem>>, %arg6: memref<16x128xf32, #tpu.memory_space<vmem>>) attributes {dimension_semantics = [#tpu.dimension_semantics<parallel>], iteration_bounds = array<i64: 2>, scalar_prefetch = 0 : i64, scratch_operands = 0 : i64, tpu.core_type = #tpu.core_type<tc>, window_params = [{transform_indices = @transform_0, window_bounds = array<i64: 16, 64>}, {pipeline_mode = #tpu.pipeline_mode<synchronous>, transform_indices = @transform_1, window_bounds = array<i64: 3, 64, 128>}, {pipeline_mode = #tpu.pipeline_mode<synchronous>, transform_indices = @transform_2, window_bounds = array<i64: 1, 128>}, {pipeline_mode = #tpu.pipeline_mode<synchronous>, transform_indices = @transform_3, window_bounds = array<i64: 3, 128, 128>}, {pipeline_mode = #tpu.pipeline_mode<synchronous>, transform_indices = @transform_4, window_bounds = array<i64: 1, 128>}, {transform_indices = @transform_5, window_bounds = array<i64: 16, 128>}]} {
    %c0 = arith.constant 0 : index
    %c0_0 = arith.constant 0 : index
    %0 = vector.load %arg1[%c0, %c0_0] : memref<16x64xf32, #tpu.memory_space<vmem>>, vector<16x64xf32>
    %1 = vector.extract_strided_slice %0 {offsets = [0, 0], sizes = [14, 64], strides = [1, 1]} : vector<16x64xf32> to vector<14x64xf32>
    %c0_1 = arith.constant 0 : index
    %c0_2 = arith.constant 0 : index
    %c0_3 = arith.constant 0 : index
    %2 = vector.load %arg2[%c0_1, %c0_2, %c0_3] : memref<3x64x128xf32, #tpu.memory_space<vmem>>, vector<1x64x128xf32>
    %3 = vector.shape_cast %2 : vector<1x64x128xf32> to vector<64x128xf32>
    %cst = arith.constant dense<0.000000e+00> : vector<14x128xf32>
    %4 = tpu.matmul %1, %3, %cst {dimension_numbers = #tpu.dot_dimension_numbers<[1], [0], [0], [1], [0, 0, 1, 1], [], []>, precision = #tpu.contract_precision<fp32>} : vector<14x64xf32>, vector<64x128xf32>, vector<14x128xf32> -> vector<14x128xf32>
    %5 = vector.extract_strided_slice %0 {offsets = [1, 0], sizes = [14, 64], strides = [1, 1]} : vector<16x64xf32> to vector<14x64xf32>
    %c1 = arith.constant 1 : index
    %c0_4 = arith.constant 0 : index
    %c0_5 = arith.constant 0 : index
    %6 = vector.load %arg2[%c1, %c0_4, %c0_5] : memref<3x64x128xf32, #tpu.memory_space<vmem>>, vector<1x64x128xf32>
    %7 = vector.shape_cast %6 : vector<1x64x128xf32> to vector<64x128xf32>
    %cst_6 = arith.constant dense<0.000000e+00> : vector<14x128xf32>
    %8 = tpu.matmul %5, %7, %cst_6 {dimension_numbers = #tpu.dot_dimension_numbers<[1], [0], [0], [1], [0, 0, 1, 1], [], []>, precision = #tpu.contract_precision<fp32>} : vector<14x64xf32>, vector<64x128xf32>, vector<14x128xf32> -> vector<14x128xf32>
    %9 = arith.addf %4, %8 : vector<14x128xf32>
    %10 = vector.extract_strided_slice %0 {offsets = [2, 0], sizes = [14, 64], strides = [1, 1]} : vector<16x64xf32> to vector<14x64xf32>
    %c2 = arith.constant 2 : index
    %c0_7 = arith.constant 0 : index
    %c0_8 = arith.constant 0 : index
    %11 = vector.load %arg2[%c2, %c0_7, %c0_8] : memref<3x64x128xf32, #tpu.memory_space<vmem>>, vector<1x64x128xf32>
    %12 = vector.shape_cast %11 : vector<1x64x128xf32> to vector<64x128xf32>
    %cst_9 = arith.constant dense<0.000000e+00> : vector<14x128xf32>
    %13 = tpu.matmul %10, %12, %cst_9 {dimension_numbers = #tpu.dot_dimension_numbers<[1], [0], [0], [1], [0, 0, 1, 1], [], []>, precision = #tpu.contract_precision<fp32>} : vector<14x64xf32>, vector<64x128xf32>, vector<14x128xf32> -> vector<14x128xf32>
    %14 = arith.addf %9, %13 : vector<14x128xf32>
    %c0_10 = arith.constant 0 : index
    %c0_11 = arith.constant 0 : index
    %15 = vector.load %arg3[%c0_10, %c0_11] : memref<1x128xf32, #tpu.memory_space<vmem>>, vector<1x128xf32>
    %16 = vector.broadcast %15 : vector<1x128xf32> to vector<14x128xf32>
    %17 = arith.addf %14, %16 : vector<14x128xf32>
    %cst_12 = arith.constant 0.000000e+00 : f32
    %18 = vector.broadcast %cst_12 : f32 to vector<14x128xf32>
    %19 = arith.maximumf %17, %18 : vector<14x128xf32>
    %20 = vector.extract_strided_slice %19 {offsets = [0, 0], sizes = [12, 128], strides = [1, 1]} : vector<14x128xf32> to vector<12x128xf32>
    %c0_13 = arith.constant 0 : index
    %c0_14 = arith.constant 0 : index
    %c0_15 = arith.constant 0 : index
    %21 = vector.load %arg4[%c0_13, %c0_14, %c0_15] : memref<3x128x128xf32, #tpu.memory_space<vmem>>, vector<1x128x128xf32>
    %22 = vector.shape_cast %21 : vector<1x128x128xf32> to vector<128x128xf32>
    %cst_16 = arith.constant dense<0.000000e+00> : vector<12x128xf32>
    %23 = tpu.matmul %20, %22, %cst_16 {dimension_numbers = #tpu.dot_dimension_numbers<[1], [0], [0], [1], [0, 0, 1, 1], [], []>, precision = #tpu.contract_precision<fp32>} : vector<12x128xf32>, vector<128x128xf32>, vector<12x128xf32> -> vector<12x128xf32>
    %24 = vector.extract_strided_slice %19 {offsets = [1, 0], sizes = [12, 128], strides = [1, 1]} : vector<14x128xf32> to vector<12x128xf32>
    %c1_17 = arith.constant 1 : index
    %c0_18 = arith.constant 0 : index
    %c0_19 = arith.constant 0 : index
    %25 = vector.load %arg4[%c1_17, %c0_18, %c0_19] : memref<3x128x128xf32, #tpu.memory_space<vmem>>, vector<1x128x128xf32>
    %26 = vector.shape_cast %25 : vector<1x128x128xf32> to vector<128x128xf32>
    %cst_20 = arith.constant dense<0.000000e+00> : vector<12x128xf32>
    %27 = tpu.matmul %24, %26, %cst_20 {dimension_numbers = #tpu.dot_dimension_numbers<[1], [0], [0], [1], [0, 0, 1, 1], [], []>, precision = #tpu.contract_precision<fp32>} : vector<12x128xf32>, vector<128x128xf32>, vector<12x128xf32> -> vector<12x128xf32>
    %28 = arith.addf %23, %27 : vector<12x128xf32>
    %29 = vector.extract_strided_slice %19 {offsets = [2, 0], sizes = [12, 128], strides = [1, 1]} : vector<14x128xf32> to vector<12x128xf32>
    %c2_21 = arith.constant 2 : index
    %c0_22 = arith.constant 0 : index
    %c0_23 = arith.constant 0 : index
    %30 = vector.load %arg4[%c2_21, %c0_22, %c0_23] : memref<3x128x128xf32, #tpu.memory_space<vmem>>, vector<1x128x128xf32>
    %31 = vector.shape_cast %30 : vector<1x128x128xf32> to vector<128x128xf32>
    %cst_24 = arith.constant dense<0.000000e+00> : vector<12x128xf32>
    %32 = tpu.matmul %29, %31, %cst_24 {dimension_numbers = #tpu.dot_dimension_numbers<[1], [0], [0], [1], [0, 0, 1, 1], [], []>, precision = #tpu.contract_precision<fp32>} : vector<12x128xf32>, vector<128x128xf32>, vector<12x128xf32> -> vector<12x128xf32>
    %33 = arith.addf %28, %32 : vector<12x128xf32>
    %c0_25 = arith.constant 0 : index
    %c0_26 = arith.constant 0 : index
    %34 = vector.load %arg5[%c0_25, %c0_26] : memref<1x128xf32, #tpu.memory_space<vmem>>, vector<1x128xf32>
    %35 = vector.broadcast %34 : vector<1x128xf32> to vector<12x128xf32>
    %36 = arith.addf %33, %35 : vector<12x128xf32>
    %cst_27 = arith.constant 0.000000e+00 : f32
    %37 = vector.broadcast %cst_27 : f32 to vector<12x128xf32>
    %38 = arith.maximumf %36, %37 : vector<12x128xf32>
    %c0_28 = arith.constant 0 : index
    %c0_29 = arith.constant 0 : index
    %39 = vector.load %arg6[%c0_28, %c0_29] : memref<16x128xf32, #tpu.memory_space<vmem>>, vector<12x128xf32>
    tpu.vector_store %arg6[%c0_28, %c0_29], %38 {strides = array<i32>} : memref<16x128xf32, #tpu.memory_space<vmem>>, vector<12x128xf32>,
    %cst_30 = arith.constant 0.000000e+00 : f32
    %40 = vector.broadcast %cst_30 : f32 to vector<4x128xf32>
    %c12 = arith.constant 12 : index
    %c0_31 = arith.constant 0 : index
    %41 = vector.load %arg6[%c12, %c0_31] : memref<16x128xf32, #tpu.memory_space<vmem>>, vector<4x128xf32>
    tpu.vector_store %arg6[%c12, %c0_31], %40 {strides = array<i32>} : memref<16x128xf32, #tpu.memory_space<vmem>>, vector<4x128xf32>,
    return
  }
  func.func @transform_0(%arg0: i32) -> (i32, i32) {
    %c0_i32 = arith.constant 0 : i32
    %c0_i32_0 = arith.constant 0 : i32
    return %arg0, %c0_i32 : i32, i32
  }
  func.func @transform_1(%arg0: i32) -> (i32, i32, i32) {
    %c0_i32 = arith.constant 0 : i32
    %c0_i32_0 = arith.constant 0 : i32
    %c0_i32_1 = arith.constant 0 : i32
    %c0_i32_2 = arith.constant 0 : i32
    return %c0_i32, %c0_i32_0, %c0_i32_1 : i32, i32, i32
  }
  func.func @transform_2(%arg0: i32) -> (i32, i32) {
    %c0_i32 = arith.constant 0 : i32
    %c0_i32_0 = arith.constant 0 : i32
    %c0_i32_1 = arith.constant 0 : i32
    return %c0_i32, %c0_i32_0 : i32, i32
  }
  func.func @transform_3(%arg0: i32) -> (i32, i32, i32) {
    %c0_i32 = arith.constant 0 : i32
    %c0_i32_0 = arith.constant 0 : i32
    %c0_i32_1 = arith.constant 0 : i32
    %c0_i32_2 = arith.constant 0 : i32
    return %c0_i32, %c0_i32_0, %c0_i32_1 : i32, i32, i32
  }
  func.func @transform_4(%arg0: i32) -> (i32, i32) {
    %c0_i32 = arith.constant 0 : i32
    %c0_i32_0 = arith.constant 0 : i32
    %c0_i32_1 = arith.constant 0 : i32
    return %c0_i32, %c0_i32_0 : i32, i32
  }
  func.func @transform_5(%arg0: i32) -> (i32, i32) {
    %c0_i32 = arith.constant 0 : i32
    %c0_i32_0 = arith.constant 0 : i32
    return %arg0, %c0_i32 : i32, i32
  }
}

</mosaic_0001>

<bundles_post_ra>
// kernel: forward.1
= control target key start
LH: loop header
LB: loop body
LE: loop exit
PB: predicated region body
PF: predicated region fallthrough
CT: control target
= control target key end

     0   :  { %10 = vsyncpa [#allocation3], 0  ;;  %s5862_s18 = smov 0   ;;  %s7717_s0 = inlined_call_operand.vmem [shape: f32[32,64], index: 0, kind: input, shape index: {}]   ;;  %s7718_s1 = inlined_call_operand.hbm [shape: f32[3,64,128], index: 1, kind: input, shape index: {}]   ;;  %s7719_s2 = inlined_call_operand.vmem [shape: f32[1,128], index: 2, kind: input, shape index: {}]   ;;  %s7720_s3 = inlined_call_operand.vmem [shape: f32[3,128,128], index: 3, kind: input, shape index: {}]   ;;  %s7721_s4 = inlined_call_operand.vmem [shape: f32[1,128], index: 4, kind: input, shape index: {}]   ;;  %s7722_s5 = inlined_call_operand.vmem [shape: f32[32,128], index: 5, kind: output, shape index: {}]  }
   0x1 LB: > { %s4245_s19 = sadd.s32 4294967295, %s5826_s18   ;;  %p4247_p0 = scmp.ge.s32.totalorder %s5826_s18, 1  ;;  %s5826_s18 = sphi %s5862_s18, %s16_s18  }
   0x2   : > { %p157_p1 = scmp.lt.s32.totalorder %s5826_s18, 3  ;;  %s5828_s20 = smov [#allocation2]  }
   0x3   : > { %s169_s21 = sshll.u32 %s5828_s20, 4  ;;  %p5874_p3 = scmp.eq.s32.totalorder %s4245_s19, 0  ;;  %s170_s21 = int_to_ptr.vmem [resolvable:$true] %s169_s21 }
   0x4   : > { %p5870_p2 = pnand %p4247_p0, %p157_p1  ;;  %s5801_s24 = scalar_lea.vmem %s170_s21, 3072 }
   0x5   : > { %p5802_p7 = scmp.ne.s32.totalorder %s170_s21, %s5801_s24  ;;  %p5809_p10 = scmp.lt.s32.totalorder %s170_s21, %s170_s21 }
   0x6   : > { %p5772_p4 = pneg %p5870_p2  ;;  %p5810_p11 = scmp.lt.s32.totalorder %s5801_s24, %s5801_s24 }
   0x8   : > { %p5773_p5 = pnand %p5874_p3, %p5772_p4  ;;  %p5811_p12 = por %p5810_p11, %p5809_p10 }
   0xa   : > { %p5792_p6 = pneg %p5773_p5 }
   0xc   : > { %p5804_p8 = pnand %p5802_p7, %p5792_p6 }
   0xe   : > { %p5805_p9 = pneg %p5804_p8 }
  0x10   : > { %p5812_p13 = pnand %p5811_p12, %p5805_p9 }
  0x12   : > { %5815 = shalt.err (!%p5812_p13)
}
  0x13   : > { %s5829_s25 = smov 128   ;;  %s5830_s26 = smov 8  }
  0x14   : > { %5775 = dma.hbm_to_vmem [thread:$0]  (!%p5773_p5), %s7718_s1, 3072, %s170_s21, [#allocation3], %s5829_s25, %s5829_s25, %s5830_s26  }
  0x15   : > { %203 = sbr.rel (%p5870_p2) target bundleno = 892 (0x37c), region = 40 }
  0x1a   : > { %5821 = dma.done.wait (%p5874_p3), [#allocation3], 3072  }
  0x1b   : > { %5823 = vsyncadd (%p5874_p3), [#allocation3], 4294964224  ;;  %s4252_s29 = sshll.u32 %s4245_s19, 1  ;;  %v261_v0 = vld [vmem:[#allocation2 + $0x78] sm:$0xff]  ;;  %v260_v1 = vld [vmem:[#allocation2 + $0x70] sm:$0xff]  ;;  %vm264_vm0 = vcmask 1046528  }
  0x1c   : > { %p232_p0 = scmp.lt.s32.totalorder %s4252_s29, 3  ;;  %v259_v2 = vld [vmem:[#allocation2 + $0x68] sm:$0xff]  ;;  %vm268_vm1 = vcmask 523264   ;;  %v5899_v3 = vand.u32 4294901760, %v261_v0  ;;  %v5901_v4 = vand.u32 4294901760, %v260_v1  ;;  %v258_v6 = vld [vmem:[#allocation2 + $0x60] sm:$0xff] }
  0x1d   : > { %v5903_v5 = vand.u32 4294901760, %v259_v2  ;;  %v257_v7 = vld [vmem:[#allocation2 + $0x58] sm:$0xff]  ;;  %v256_v8 = vld [vmem:[#allocation2 + $0x50] sm:$0xff]  ;;  %v5905_v9 = vand.u32 4294901760, %v258_v6  ;;  %v255_v12 = vld [vmem:[#allocation2 + $0x48] sm:$0xff]  ;;  %vm1446_vm2 = vcmask 1045504  }
  0x1e   : > { %s7834_s29 = smov (!%p232_p0, %s4252_s29), 3  ;;  %v5907_v10 = vand.u32 4294901760, %v257_v7  ;;  %v5909_v11 = vand.u32 4294901760, %v256_v8  ;;  %v254_v13 = vld [vmem:[#allocation2 + $0x40] sm:$0xff]  ;;  %4796 = vmatprep.subr.mxu0 %v5899_v3  ;;  %v5915_v15 = vsub.f32 %v261_v0, %v5899_v3  ;;  %v5918_v16 = vsub.f32 %v260_v1, %v5901_v4 }
  0x1f   : > { %s4253_s30 = sshll.u32 %s7834_s29, 3  ;;  %v5920_v17 = vand.u32 4294901760, %v255_v12  ;;  %v5923_v18 = vsub.f32 %v259_v2, %v5903_v5  ;;  %4797 = vmatpush3.msra.mxu0 %v5899_v3  ;;  %v5928_v20 = vand.u32 4294901760, %v254_v13  ;;  %v5931_v21 = vsub.f32 %v258_v6, %v5905_v9 }
  0x20   : > { %s235_s8 = scalar_lea.vmem %s7717_s0, %s4253_s30  ;;  %4798 = vmatprep.subr.mxu0 %v5901_v4  ;;  %v5937_v24 = vand.u32 4294901760, %v5915_v15  ;;  %v5940_v25 = vand.u32 4294901760, %v5918_v16  ;;  %v5946_v27 = vsub.f32 %v257_v7, %v5907_v10  ;;  %v5955_v31 = vsub.f32 %v256_v8, %v5909_v11  ;;  %s241_s24 = scalar_lea.vmem %s7722_s5, %s4253_s30 }
  0x21   : > { %v5911_v14 = vld [vmem:[%s235_s8] sm:$0xff]  ;;  %v5925_v19 = vld [vmem:[%s235_s8 + $0x8] sm:$0xff]  ;;  %v5943_v26 = vand.u32 4294901760, %v5923_v18  ;;  %4799 = vmatpush3.msra.mxu0 %v5901_v4  ;;  %v5950_v28 = vand.u32 4294901760, %v5931_v21  ;;  %v5991_v47 = vsub.f32 %v255_v12, %v5920_v17  ;;  %v5994_v48 = vsub.f32 %v254_v13, %v5928_v20  ;;  %v252_v12 = vld [vmem:[#allocation2 + $0x38] sm:$0xff] }
  0x22   : > { %v265_v22 = vrot.slane %v5911_v14, 1  ;;  %v266_v23 = vrot.slane %v5925_v19, 1  ;;  %4800 = vmatprep.subr.mxu0 %v5903_v5  ;;  %v386_v32 = vsub.f32 %v5915_v15, %v5937_v24  ;;  %v393_v33 = vsub.f32 %v5918_v16, %v5940_v25 }
  0x23   : > { %v400_v34 = vsub.f32 %v5923_v18, %v5943_v26  ;;  %4801 = vmatpush3.msra.mxu0 %v5903_v5  ;;  %v5969_v37 = vand.u32 4294901760, %v5946_v27  ;;  %v407_v41 = vsub.f32 %v5931_v21, %v5950_v28  ;;  %v5984_v44 = vand.u32 4294901760, %v5955_v31 }
  0x24   : > { %v267_v29 = vsel %vm264_vm0, %v265_v22, %v266_v23  ;;  %v271_v30 = vsel %vm268_vm1, %v266_v23, 0  ;;  %4802 = vmatprep.subr.mxu0 %v5905_v9  ;;  %v387_v39 = vand.u32 4294901760, %v386_v32  ;;  %v394_v40 = vand.u32 4294901760, %v393_v33 }
  0x25   : > { %v269_v35 = vsel %vm268_vm1, %v267_v29, 0  ;;  %v5971_v38 = vand.u32 4294901760, %v271_v30  ;;  %4803 = vmatpush3.msra.mxu0 %v5905_v9  ;;  %v401_v45 = vand.u32 4294901760, %v400_v34  ;;  %v414_v46 = vsub.f32 %v5946_v27, %v5969_v37  ;;  %v245_v34 = vld [vmem:[#allocation2] sm:$0xff] }
  0x26   : > { %v5966_v36 = vand.u32 4294901760, %v269_v35  ;;  %4804 = vmatprep.subr.mxu0 %v5907_v10  ;;  %4815 = vmatprep.subr.mxu1 %v387_v39  ;;  %v408_v51 = vand.u32 4294901760, %v407_v41  ;;  %v6001_v52 = vand.u32 4294901760, %v5991_v47  ;;  %v421_v55 = vsub.f32 %v5955_v31, %v5984_v44 }
  0x27   : > { %v5981_v43 = vsub.f32 %v271_v30, %v5971_v38  ;;  %4805 = vmatpush3.msra.mxu0 %v5907_v10  ;;  %4816 = vmatpush3.msra.mxu1 %v387_v39  ;;  %v6013_v56 = vand.u32 4294901760, %v5994_v48  ;;  %v415_v57 = vand.u32 4294901760, %v414_v46  ;;  %v1447_v1 = vrot.slane %v5911_v14, 2 }
  0x28   : > { %v5978_v42 = vsub.f32 %v269_v35, %v5966_v36  ;;  %4831 = vmatprep.mubr.f32.mxu1 %v5966_v36  ;;  %4806 = vmatprep.subr.mxu0 %v5909_v11  ;;  %v428_v60 = vsub.f32 %v5991_v47, %v6001_v52  ;;  %v422_v61 = vand.u32 4294901760, %v421_v55  ;;  %v1448_v2 = vrot.slane %v5925_v19, 2 }
  0x29   : > { %v358_v50 = vand.u32 4294901760, %v5981_v43  ;;  %4817 = vmatprep.subr.mxu1 %v394_v40  ;;  %4807 = vmatpush3.msra.mxu0 %v5909_v11  ;;  %v435_v62 = vsub.f32 %v5994_v48, %v6013_v56  ;;  %v6074_v13 = vand.u32 4294901760, %v252_v12 }
  0x2a   : > { %v348_v49 = vand.u32 4294901760, %v5978_v42  ;;  %4818 = vmatpush3.msra.mxu1 %v394_v40  ;;  %4808 = vmatprep.subr.mxu0 %v5920_v17  ;;  %v429_v63 = vand.u32 4294901760, %v428_v60  ;;  %v1449_v6 = vsel %vm1446_vm2, %v1447_v1, %v1448_v2  ;;  %v6049_v7 = vsel %vm268_vm1, %v1448_v2, 0  ;;  %v1445_v2 = vld [vmem:[#allocation2 + $0xb8] sm:$0xff] }
  0x2b   : > { %v359_v54 = vsub.f32 %v5981_v43, %v358_v50  ;;  %4819 = vmatprep.subr.mxu1 %v401_v45  ;;  %4809 = vmatpush3.msra.mxu0 %v5920_v17  ;;  %v436_v0 = vand.u32 4294901760, %v435_v62  ;;  %v6054_v8 = vsel %vm268_vm1, %v1449_v6, 0  ;;  %v6089_v22 = vsub.f32 %v252_v12, %v6074_v13  ;;  %v1444_v6 = vld [vmem:[#allocation2 + $0xb0] sm:$0xff] }
  0x2c   : > { %v349_v53 = vsub.f32 %v5978_v42, %v348_v49  ;;  %4820 = vmatpush3.msra.mxu1 %v401_v45  ;;  %4810 = vmatprep.subr.mxu0 %v5928_v20  ;;  %v6271_v12 = vand.u32 4294901760, %v1445_v2 }
  0x2d   : > { %v360_v59 = vand.u32 4294901760, %v359_v54  ;;  %4821 = vmatprep.subr.mxu1 %v408_v51  ;;  %4811 = vmatpush3.msra.mxu0 %v5928_v20 }
  0x2e   : > { %v350_v58 = vand.u32 4294901760, %v349_v53  ;;  %4822 = vmatpush3.msra.mxu1 %v408_v51  ;;  %4834 = vmatprep.subr.mxu0 %v5915_v15 }
  0x2f   : > { %4823 = vmatprep.subr.mxu1 %v415_v57 }
  0x30   : > { %4812 = vmatprep.mubr.f32.mxu0 %v350_v58  ;;  %4824 = vmatpush3.msra.mxu1 %v415_v57 }
  0x31   : > { %4813 = vmatmul.mubr.f32.vlgmr.msra.gmra.mxu0 %v360_v59  ;;  %4825 = vmatprep.subr.mxu1 %v422_v61 }
  0x32   : > { %4835 = vmatpush3.msra.mxu0 %v5915_v15  ;;  %4826 = vmatpush3.msra.mxu1 %v422_v61  ;;  %v251_v15 = vld [vmem:[#allocation2 + $0x30] sm:$0xff] }
  0x33   : > { %4836 = vmatprep.subr.mxu0 %v5918_v16  ;;  %4827 = vmatprep.subr.mxu1 %v429_v63 }
  0x34   : > { %4837 = vmatpush3.msra.mxu0 %v5918_v16  ;;  %4828 = vmatpush3.msra.mxu1 %v429_v63  ;;  %v250_v16 = vld [vmem:[#allocation2 + $0x28] sm:$0xff] }
  0x35   : > { %4838 = vmatprep.subr.mxu0 %v5923_v18  ;;  %4829 = vmatprep.subr.mxu1 %v436_v0  ;;  %v6093_v23 = vand.u32 4294901760, %v250_v16 }
  0x36   : > { %4839 = vmatpush3.msra.mxu0 %v5923_v18  ;;  %4830 = vmatpush3.msra.mxu1 %v436_v0  ;;  %v6084_v18 = vand.u32 4294901760, %v251_v15 }
  0x37   : > { %4840 = vmatprep.subr.mxu0 %v5931_v21  ;;  %4832 = vmatmul.mubr.f32.vlgmr.msra.gmra.mxu1 %v5971_v38  ;;  %v6120_v29 = vsub.f32 %v250_v16, %v6093_v23  ;;  %v6278_v16 = vand.u32 4294901760, %v1444_v6 }
  0x38   : > { %4841 = vmatpush3.msra.mxu0 %v5931_v21  ;;  %4853 = vmatprep.subr.mxu1 %v5899_v3  ;;  %v249_v21 = vld [vmem:[#allocation2 + $0x20] sm:$0xff] }
  0x39   : > { %4842 = vmatprep.subr.mxu0 %v5946_v27  ;;  %4854 = vmatpush3.msra.mxu1 %v5899_v3  ;;  %v6148_v39 = vand.u32 4294901760, %v6120_v29 }
  0x3a   : > { %4843 = vmatpush3.msra.mxu0 %v5946_v27  ;;  %4855 = vmatprep.subr.mxu1 %v5901_v4  ;;  %v6106_v27 = vsub.f32 %v251_v15, %v6084_v18  ;;  %v1443_v15 = vld [vmem:[#allocation2 + $0xa8] sm:$0xff] }
  0x3b   : > { %4844 = vmatprep.subr.mxu0 %v5955_v31  ;;  %4856 = vmatpush3.msra.mxu1 %v5901_v4  ;;  %v984_v46 = vsub.f32 %v6120_v29, %v6148_v39 }
  0x3c   : > { %4845 = vmatpush3.msra.mxu0 %v5955_v31  ;;  %4857 = vmatprep.subr.mxu1 %v5903_v5  ;;  %v6131_v32 = vand.u32 4294901760, %v6106_v27 }
  0x3d   : > { %4846 = vmatprep.subr.mxu0 %v5991_v47  ;;  %4858 = vmatpush3.msra.mxu1 %v5903_v5 }
  0x3e   : > { %4847 = vmatpush3.msra.mxu0 %v5991_v47  ;;  %4859 = vmatprep.subr.mxu1 %v5905_v9  ;;  %v977_v41 = vsub.f32 %v6106_v27, %v6131_v32 }
  0x3f   : > { %4848 = vmatprep.subr.mxu0 %v5994_v48  ;;  %4850 = vmatprep.mubr.f32.mxu0 %v5978_v42  ;;  %v6162_v42 = vand.u32 4294901760, %v245_v34 }
  0x40   : > { %4849 = vmatpush3.msra.mxu0 %v5994_v48  ;;  %4860 = vmatpush3.msra.mxu1 %v5905_v9 }
  0x41   : > { %4851 = vmatmul.mubr.f32.vlgmr.msra.gmra.mxu0 %v5981_v43  ;;  %4861 = vmatprep.subr.mxu1 %v5907_v10 }
  0x42   : > { %4872 = vmatprep.subr.mxu0 %v5937_v24  ;;  %4862 = vmatpush3.msra.mxu1 %v5907_v10 }
  0x43   : > { %4873 = vmatpush3.msra.mxu0 %v5937_v24  ;;  %4863 = vmatprep.subr.mxu1 %v5909_v11  ;;  %v853_v24 = vsel %vm268_vm1, %v5911_v14, 0  ;;  %v247_v14 = vld [vmem:[#allocation2 + $0x10] sm:$0xff] }
  0x44   : > { %4874 = vmatprep.subr.mxu0 %v5940_v25  ;;  %4864 = vmatpush3.msra.mxu1 %v5909_v11  ;;  %v6128_v31 = vand.u32 4294901760, %v247_v14 }
  0x45   : > { %4875 = vmatpush3.msra.mxu0 %v5940_v25  ;;  %4865 = vmatprep.subr.mxu1 %v5920_v17  ;;  %v855_v25 = vsel %vm268_vm1, %v5925_v19, 0 }
  0x46   : > { %4876 = vmatprep.subr.mxu0 %v5943_v26  ;;  %4866 = vmatpush3.msra.mxu1 %v5920_v17  ;;  %v6122_v30 = vand.u32 4294901760, %v855_v25 }
  0x47   : > { %4877 = vmatpush3.msra.mxu0 %v5943_v26  ;;  %4867 = vmatprep.subr.mxu1 %v5928_v20  ;;  %v6103_v26 = vand.u32 4294901760, %v249_v21 }
  0x48   : > { %4878 = vmatprep.subr.mxu0 %v5950_v28  ;;  %4868 = vmatpush3.msra.mxu1 %v5928_v20  ;;  %v6151_v40 = vsub.f32 %v855_v25, %v6122_v30  ;;  %v6296_v25 = vsub.f32 %v1444_v6, %v6278_v16 }
  0x49   : > { %4869 = vmatprep.mubr.f32.mxu1 %v348_v49  ;;  %4879 = vmatpush3.msra.mxu0 %v5950_v28  ;;  %v6113_v28 = vand.u32 4294901760, %v853_v24  ;;  %v6134_v33 = vsub.f32 %v249_v21, %v6103_v26  ;;  %v1442_v21 = vld [vmem:[#allocation2 + $0xa0] sm:$0xff] }
  0x4a   : > { %4870 = vmatmul.mubr.f32.vlgmr.msra.gmra.mxu1 %v358_v50  ;;  %4880 = vmatprep.subr.mxu0 %v5969_v37  ;;  %v942_v47 = vand.u32 4294901760, %v6151_v40 }
  0x4b   : > { %4891 = vmatprep.subr.mxu1 %v5899_v3  ;;  %4881 = vmatpush3.msra.mxu0 %v5969_v37  ;;  %v6141_v35 = vsub.f32 %v853_v24, %v6113_v28  ;;  %v6165_v43 = vand.u32 4294901760, %v6134_v33  ;;  %v6287_v24 = vsub.f32 %v1445_v2, %v6271_v12 }
  0x4c   : > { %4892 = vmatpush3.msra.mxu1 %v5899_v3  ;;  %4882 = vmatprep.subr.mxu0 %v5984_v44  ;;  %v248_v3 = vld [vmem:[#allocation2 + $0x18] sm:$0xff]  ;;  %v943_v53 = vsub.f32 %v6151_v40, %v942_v47 }
  0x4d   : > { %4893 = vmatprep.subr.mxu1 %v5901_v4  ;;  %4883 = vmatpush3.msra.mxu0 %v5984_v44  ;;  %v6117_v19 = vand.u32 4294901760, %v248_v3  ;;  %v6168_v44 = vsub.f32 %v247_v14, %v6128_v31  ;;  %v932_v45 = vand.u32 4294901760, %v6141_v35  ;;  %v991_v50 = vsub.f32 %v6134_v33, %v6165_v43 }
  0x4e   : > { %4894 = vmatpush3.msra.mxu1 %v5901_v4  ;;  %4884 = vmatprep.subr.mxu0 %v6001_v52  ;;  %v6111_v4 = vand.u32 4294901760, %v6089_v22  ;;  %v944_v59 = vand.u32 4294901760, %v943_v53  ;;  %v6308_v14 = vand.u32 4294901760, %v6287_v24 }
  0x4f   : > { %4895 = vmatprep.subr.mxu1 %v5903_v5  ;;  %4885 = vmatpush3.msra.mxu0 %v6001_v52  ;;  %v6191_v51 = vand.u32 4294901760, %v6168_v44  ;;  %v6194_v52 = vsub.f32 %v245_v34, %v6162_v42 }
  0x50   : > { %4896 = vmatpush3.msra.mxu1 %v5903_v5  ;;  %4886 = vmatprep.subr.mxu0 %v6013_v56  ;;  %v246_v5 = vld [vmem:[#allocation2 + $0x8] sm:$0xff] }
  0x51   : > { %4897 = vmatprep.subr.mxu1 %v5905_v9  ;;  %4887 = vmatpush3.msra.mxu0 %v6013_v56  ;;  %v6145_v37 = vand.u32 4294901760, %v246_v5  ;;  %v1005_v56 = vsub.f32 %v6168_v44, %v6191_v51  ;;  %v6215_v57 = vand.u32 4294901760, %v6194_v52 }
  0x52   : > { %4888 = vmatprep.mubr.f32.mxu0 %v5966_v36  ;;  %4898 = vmatpush3.msra.mxu1 %v5905_v9  ;;  %v970_v9 = vsub.f32 %v6089_v22, %v6111_v4 }
  0x53   : > { %4889 = vmatmul.mubr.f32.vlgmr.msra.gmra.mxu0 %v5971_v38  ;;  %4899 = vmatprep.subr.mxu1 %v5907_v10  ;;  %v6182_v49 = vsub.f32 %v246_v5, %v6145_v37  ;;  %v1006_v62 = vand.u32 4294901760, %v1005_v56  ;;  %v1019_v63 = vsub.f32 %v6194_v52, %v6215_v57  ;;  %v6316_v5 = vand.u32 4294901760, %v6049_v7 }
  0x54   : > { %4910 = vmatprep.subr.mxu0 %v6074_v13  ;;  %4900 = vmatpush3.msra.mxu1 %v5907_v10  ;;  %v6154_v10 = vsub.f32 %v248_v3, %v6117_v19  ;;  %v1441_v3 = vld [vmem:[#allocation2 + $0x98] sm:$0xff] }
  0x55   : > { %4911 = vmatpush3.msra.mxu0 %v6074_v13  ;;  %4901 = vmatprep.subr.mxu1 %v5909_v11  ;;  %v6208_v55 = vand.u32 4294901760, %v6182_v49  ;;  %v1020_v1 = vand.u32 4294901760, %v1019_v63 }
  0x56   : > { %4912 = vmatprep.subr.mxu0 %v6084_v18  ;;  %4902 = vmatpush3.msra.mxu1 %v5909_v11  ;;  %v971_v11 = vand.u32 4294901760, %v970_v9  ;;  %v6179_v48 = vand.u32 4294901760, %v6154_v10 }
  0x57   : > { %4913 = vmatpush3.msra.mxu0 %v6084_v18  ;;  %4903 = vmatprep.subr.mxu1 %v5920_v17  ;;  %v1012_v61 = vsub.f32 %v6182_v49, %v6208_v55 }
  0x58   : > { %4914 = vmatprep.subr.mxu0 %v6093_v23  ;;  %4904 = vmatpush3.msra.mxu1 %v5920_v17  ;;  %v978_v17 = vand.u32 4294901760, %v977_v41  ;;  %v998_v54 = vsub.f32 %v6154_v10, %v6179_v48 }
  0x59   : > { %4915 = vmatpush3.msra.mxu0 %v6093_v23  ;;  %4905 = vmatprep.subr.mxu1 %v5928_v20  ;;  %v1013_v0 = vand.u32 4294901760, %v1012_v61 }
  0x5a   : > { %4916 = vmatprep.subr.mxu0 %v6103_v26  ;;  %4906 = vmatpush3.msra.mxu1 %v5928_v20  ;;  %v933_v20 = vsub.f32 %v6141_v35, %v932_v45  ;;  %v999_v60 = vand.u32 4294901760, %v998_v54 }
  0x5b   : > { %4907 = vmatprep.mubr.f32.mxu1 %v5966_v36  ;;  %4917 = vmatpush3.msra.mxu0 %v6103_v26  ;;  %v985_v36 = vand.u32 4294901760, %v984_v46 }
  0x5c   : > { %4908 = vmatmul.mubr.f32.vlgmr.msra.gmra.mxu1 %v5971_v38  ;;  %4918 = vmatprep.subr.mxu0 %v6117_v19  ;;  %v992_v38 = vand.u32 4294901760, %v991_v50  ;;  %v934_v58 = vand.u32 4294901760, %v933_v20 }
  0x5d   : > { %4929 = vmatprep.subr.mxu1 %v971_v11  ;;  %4919 = vmatpush3.msra.mxu0 %v6117_v19 }
  0x5e   : > { %4930 = vmatpush3.msra.mxu1 %v971_v11  ;;  %4920 = vmatprep.subr.mxu0 %v6128_v31 }
  0x5f   : > { %4931 = vmatprep.subr.mxu1 %v978_v17  ;;  %4921 = vmatpush3.msra.mxu0 %v6128_v31 }
  0x60   : > { %4932 = vmatpush3.msra.mxu1 %v978_v17  ;;  %4922 = vmatprep.subr.mxu0 %v6145_v37 }
  0x61   : > { %4933 = vmatprep.subr.mxu1 %v985_v36  ;;  %4923 = vmatpush3.msra.mxu0 %v6145_v37 }
  0x62   : > { %4934 = vmatpush3.msra.mxu1 %v985_v36  ;;  %4924 = vmatprep.subr.mxu0 %v6162_v42 }
  0x63   : > { %4935 = vmatprep.subr.mxu1 %v992_v38  ;;  %4925 = vmatpush3.msra.mxu0 %v6162_v42 }
  0x64   : > { %4926 = vmatprep.mubr.f32.mxu0 %v934_v58  ;;  %4936 = vmatpush3.msra.mxu1 %v992_v38 }
  0x65   : > { %4927 = vmatmul.mubr.f32.vlgmr.msra.gmra.mxu0 %v944_v59  ;;  %4937 = vmatprep.subr.mxu1 %v999_v60 }
  0x66   : > { %4948 = vmatprep.subr.mxu0 %v6089_v22  ;;  %4938 = vmatpush3.msra.mxu1 %v999_v60  ;;  %v4272_v60 = vld [vmem:[%s7720_s3 + $0xf8] sm:$0xff] }
  0x67   : > { %4949 = vmatpush3.msra.mxu0 %v6089_v22  ;;  %4939 = vmatprep.subr.mxu1 %v1006_v62  ;;  %v6284_v22 = vand.u32 4294901760, %v1443_v15  ;;  %v6498_v61 = vand.u32 4294901760, %v4272_v60 }
  0x68   : > { %4950 = vmatprep.subr.mxu0 %v6106_v27  ;;  %4940 = vmatpush3.msra.mxu1 %v1006_v62  ;;  %v4271_v62 = vld [vmem:[%s7720_s3 + $0xf0] sm:$0xff] }
  0x69   : > { %4951 = vmatpush3.msra.mxu0 %v6106_v27  ;;  %4941 = vmatprep.subr.mxu1 %v1013_v0  ;;  %v1440_v27 = vld [vmem:[#allocation2 + $0x90] sm:$0xff]  ;;  %v6504_v63 = vsub.f32 %v4272_v60, %v6498_v61 }
  0x6a   : > { %4952 = vmatprep.subr.mxu0 %v6120_v29  ;;  %4942 = vmatpush3.msra.mxu1 %v1013_v0  ;;  %v6506_v0 = vand.u32 4294901760, %v4271_v62 }
  0x6b   : > { %4953 = vmatpush3.msra.mxu0 %v6120_v29  ;;  %4943 = vmatprep.subr.mxu1 %v1020_v1  ;;  %v6311_v29 = vsub.f32 %v1443_v15, %v6284_v22  ;;  %v6514_v2 = vand.u32 4294901760, %v6504_v63  ;;  %v4269_v15 = vld [vmem:[%s7720_s3 + $0xe0] sm:$0xff] }
  0x6c   : > { %4954 = vmatprep.subr.mxu0 %v6134_v33  ;;  %4944 = vmatpush3.msra.mxu1 %v1020_v1  ;;  %v4270_v1 = vld [vmem:[%s7720_s3 + $0xe8] sm:$0xff]  ;;  %v6517_v6 = vsub.f32 %v4271_v62, %v6506_v0 }
  0x6d   : > { %4945 = vmatprep.mubr.f32.mxu1 %v6113_v28  ;;  %4955 = vmatpush3.msra.mxu0 %v6134_v33  ;;  %v6323_v33 = vand.u32 4294901760, %v6296_v25  ;;  %7779 = vst [vmem:[#allocation5_spill] sm:$0xff] %v6514_v2 }
  0x6e   : > { %4946 = vmatmul.mubr.f32.vlgmr.msra.gmra.mxu1 %v6122_v30  ;;  %4956 = vmatprep.subr.mxu0 %v6154_v10 }
  0x6f   : > { %4967 = vmatprep.subr.mxu1 %v6074_v13  ;;  %4957 = vmatpush3.msra.mxu0 %v6154_v10 }
  0x70   : > { %4968 = vmatpush3.msra.mxu1 %v6074_v13  ;;  %4958 = vmatprep.subr.mxu0 %v6168_v44 }
  0x71   : > { %4969 = vmatprep.subr.mxu1 %v6084_v18  ;;  %4959 = vmatpush3.msra.mxu0 %v6168_v44 }
  0x72   : > { %4970 = vmatpush3.msra.mxu1 %v6084_v18  ;;  %4960 = vmatprep.subr.mxu0 %v6182_v49 }
  0x73   : > { %4971 = vmatprep.subr.mxu1 %v6093_v23  ;;  %4961 = vmatpush3.msra.mxu0 %v6182_v49 }
  0x74   : > { %4972 = vmatpush3.msra.mxu1 %v6093_v23  ;;  %4962 = vmatprep.subr.mxu0 %v6194_v52 }
  0x75   : > { %4973 = vmatprep.subr.mxu1 %v6103_v26  ;;  %4963 = vmatpush3.msra.mxu0 %v6194_v52 }
  0x76   : > { %4964 = vmatprep.mubr.f32.mxu0 %v6141_v35  ;;  %4974 = vmatpush3.msra.mxu1 %v6103_v26  ;;  %v1567_v35 = vsub.f32 %v6287_v24, %v6308_v14 }
  0x77   : > { %4965 = vmatmul.mubr.f32.vlgmr.msra.gmra.mxu0 %v6151_v40  ;;  %4975 = vmatprep.subr.mxu1 %v6117_v19  ;;  %v6341_v40 = vand.u32 4294901760, %v6311_v29 }
  0x78   : > { %4986 = vmatprep.subr.mxu0 %v6111_v4  ;;  %4976 = vmatpush3.msra.mxu1 %v6117_v19 }
  0x79   : > { %4987 = vmatpush3.msra.mxu0 %v6111_v4  ;;  %4977 = vmatprep.subr.mxu1 %v6128_v31  ;;  %v6301_v4 = vand.u32 4294901760, %v6054_v8  ;;  %v1581_v11 = vsub.f32 %v6311_v29, %v6341_v40 }
  0x7a   : > { %4988 = vmatprep.subr.mxu0 %v6131_v32  ;;  %4978 = vmatpush3.msra.mxu1 %v6128_v31 }
  0x7b   : > { %4989 = vmatpush3.msra.mxu0 %v6131_v32  ;;  %4979 = vmatprep.subr.mxu1 %v6145_v37  ;;  %v6320_v32 = vand.u32 4294901760, %v1440_v27  ;;  %v6332_v34 = vsub.f32 %v6054_v8, %v6301_v4  ;;  %v6350_v8 = vsub.f32 %v6049_v7, %v6316_v5 }
  0x7c   : > { %4990 = vmatprep.subr.mxu0 %v6148_v39  ;;  %4980 = vmatpush3.msra.mxu1 %v6145_v37 }
  0x7d   : > { %4991 = vmatpush3.msra.mxu0 %v6148_v39  ;;  %4981 = vmatprep.subr.mxu1 %v6162_v42  ;;  %v6362_v44 = vsub.f32 %v1440_v27, %v6320_v32  ;;  %v1529_v7 = vand.u32 4294901760, %v6332_v34 }
  0x7e   : > { %4992 = vmatprep.subr.mxu0 %v6165_v43  ;;  %4982 = vmatpush3.msra.mxu1 %v6162_v42 }
  0x7f   : > { %4983 = vmatprep.mubr.f32.mxu1 %v932_v45  ;;  %4993 = vmatpush3.msra.mxu0 %v6165_v43  ;;  %v6385_v49 = vand.u32 4294901760, %v6362_v44 }
  0x80   : > { %4984 = vmatmul.mubr.f32.vlgmr.msra.gmra.mxu1 %v942_v47  ;;  %4994 = vmatprep.subr.mxu0 %v6179_v48 }
  0x81   : > { %5005 = vmatprep.subr.mxu1 %v6074_v13  ;;  %4995 = vmatpush3.msra.mxu0 %v6179_v48  ;;  %v1602_v20 = vsub.f32 %v6362_v44, %v6385_v49 }
  0x82   : > { %5006 = vmatpush3.msra.mxu1 %v6074_v13  ;;  %4996 = vmatprep.subr.mxu0 %v6191_v51  ;;  %v6293_v13 = vand.u32 4294901760, %v1442_v21 }
  0x83   : > { %5007 = vmatprep.subr.mxu1 %v6084_v18  ;;  %4997 = vmatpush3.msra.mxu0 %v6191_v51  ;;  %v1603_v56 = vand.u32 4294901760, %v1602_v20 }
  0x84   : > { %5008 = vmatpush3.msra.mxu1 %v6084_v18  ;;  %4998 = vmatprep.subr.mxu0 %v6208_v55  ;;  %v6305_v18 = vand.u32 4294901760, %v1441_v3  ;;  %v6326_v9 = vsub.f32 %v1442_v21, %v6293_v13  ;;  %v6529_v21 = vand.u32 4294901760, %v6517_v6 }
  0x85   : > { %5009 = vmatprep.subr.mxu1 %v6093_v23  ;;  %4999 = vmatpush3.msra.mxu0 %v6208_v55 }
  0x86   : > { %5010 = vmatpush3.msra.mxu1 %v6093_v23  ;;  %5000 = vmatprep.subr.mxu0 %v6215_v57  ;;  %v1439_v23 = vld [vmem:[#allocation2 + $0x88] sm:$0xff]  ;;  %v6344_v10 = vsub.f32 %v1441_v3, %v6305_v18  ;;  %v6359_v43 = vand.u32 4294901760, %v6326_v9  ;;  %7780 = vst [vmem:[#allocation6_spill] sm:$0xff] %v6529_v21  ;;  %v4268_v3 = vld [vmem:[%s7720_s3 + $0xd8] sm:$0xff] }
  0x87   : > { %5011 = vmatprep.subr.mxu1 %v6103_v26  ;;  %5001 = vmatpush3.msra.mxu0 %v6215_v57  ;;  %v6338_v39 = vand.u32 4294901760, %v1439_v23 }
  0x88   : > { %5002 = vmatprep.mubr.f32.mxu0 %v6113_v28  ;;  %5012 = vmatpush3.msra.mxu1 %v6103_v26  ;;  %v1438_v26 = vld [vmem:[#allocation2 + $0x80] sm:$0xff]  ;;  %v6372_v45 = vand.u32 4294901760, %v6344_v10  ;;  %v1588_v48 = vsub.f32 %v6326_v9, %v6359_v43 }
  0x89   : > { %5003 = vmatmul.mubr.f32.vlgmr.msra.gmra.mxu0 %v6122_v30  ;;  %5013 = vmatprep.subr.mxu1 %v6117_v19  ;;  %v6356_v41 = vand.u32 4294901760, %v1438_v26  ;;  %v6375_v46 = vsub.f32 %v1439_v23, %v6338_v39 }
  0x8a   : > { %5024 = vmatprep.subr.mxu0 %v6271_v12  ;;  %5014 = vmatpush3.msra.mxu1 %v6117_v19  ;;  %v1574_v19 = vsub.f32 %v6296_v25, %v6323_v33  ;;  %v1595_v50 = vsub.f32 %v6344_v10, %v6372_v45  ;;  %v1589_v52 = vand.u32 4294901760, %v1588_v48 }
  0x8b   : > { %5025 = vmatpush3.msra.mxu0 %v6271_v12  ;;  %5015 = vmatprep.subr.mxu1 %v6128_v31  ;;  %v6388_v17 = vsub.f32 %v1438_v26, %v6356_v41  ;;  %v6399_v51 = vand.u32 4294901760, %v6375_v46 }
  0x8c   : > { %5026 = vmatprep.subr.mxu0 %v6278_v16  ;;  %5016 = vmatpush3.msra.mxu1 %v6128_v31  ;;  %v1568_v31 = vand.u32 4294901760, %v1567_v35  ;;  %v1575_v47 = vand.u32 4294901760, %v1574_v19  ;;  %v1596_v54 = vand.u32 4294901760, %v1595_v50  ;;  %v4262_v50 = vld [vmem:[%s7720_s3 + $0xa8] sm:$0xff] }
  0x8d   : > { %5027 = vmatpush3.msra.mxu0 %v6278_v16  ;;  %5017 = vmatprep.subr.mxu1 %v6145_v37  ;;  %v6409_v36 = vand.u32 4294901760, %v6388_v17  ;;  %v1609_v55 = vsub.f32 %v6375_v46, %v6399_v51  ;;  %v6638_v20 = vand.u32 4294901760, %v4262_v50 }
  0x8e   : > { %5028 = vmatprep.subr.mxu0 %v6284_v22  ;;  %5018 = vmatpush3.msra.mxu1 %v6145_v37  ;;  %v1539_v37 = vand.u32 4294901760, %v6350_v8 }
  0x8f   : > { %5029 = vmatpush3.msra.mxu0 %v6284_v22  ;;  %5019 = vmatprep.subr.mxu1 %v6162_v42  ;;  %v1616_v57 = vsub.f32 %v6388_v17, %v6409_v36  ;;  %v1610_v58 = vand.u32 4294901760, %v1609_v55 }
  0x90   : > { %5030 = vmatprep.subr.mxu0 %v6293_v13  ;;  %5020 = vmatpush3.msra.mxu1 %v6162_v42  ;;  %v1582_v42 = vand.u32 4294901760, %v1581_v11 }
  0x91   : > { %5021 = vmatprep.mubr.f32.mxu1 %v6113_v28  ;;  %5031 = vmatpush3.msra.mxu0 %v6293_v13  ;;  %v1530_v28 = vsub.f32 %v6332_v34, %v1529_v7  ;;  %v1617_v59 = vand.u32 4294901760, %v1616_v57 }
  0x92   : > { %5022 = vmatmul.mubr.f32.vlgmr.msra.gmra.mxu1 %v6122_v30  ;;  %5032 = vmatprep.subr.mxu0 %v6305_v18  ;;  %v1540_v30 = vsub.f32 %v6350_v8, %v1539_v37 }
  0x93   : > { %5043 = vmatprep.subr.mxu1 %v1568_v31  ;;  %5033 = vmatpush3.msra.mxu0 %v6305_v18  ;;  %v1531_v53 = vand.u32 4294901760, %v1530_v28 }
  0x94   : > { %5044 = vmatpush3.msra.mxu1 %v1568_v31  ;;  %5034 = vmatprep.subr.mxu0 %v6320_v32  ;;  %v1541_v38 = vand.u32 4294901760, %v1540_v30 }
  0x95   : > { %5045 = vmatprep.subr.mxu1 %v1575_v47  ;;  %5035 = vmatpush3.msra.mxu0 %v6320_v32 }
  0x96   : > { %5046 = vmatpush3.msra.mxu1 %v1575_v47  ;;  %5036 = vmatprep.subr.mxu0 %v6338_v39  ;;  %v4263_v47 = vld [vmem:[%s7720_s3 + $0xb0] sm:$0xff] }
  0x97   : > { %5047 = vmatprep.subr.mxu1 %v1582_v42  ;;  %5037 = vmatpush3.msra.mxu0 %v6338_v39  ;;  %v6621_v28 = vand.u32 4294901760, %v4263_v47 }
  0x98   : > { %5048 = vmatpush3.msra.mxu1 %v1582_v42  ;;  %5038 = vmatprep.subr.mxu0 %v6356_v41 }
  0x99   : > { %5049 = vmatprep.subr.mxu1 %v1589_v52  ;;  %5039 = vmatpush3.msra.mxu0 %v6356_v41 }
  0x9a   : > { %5050 = vmatpush3.msra.mxu1 %v1589_v52  ;;  %5040 = vmatprep.mubr.f32.mxu0 %v1531_v53  ;;  %v6636_v52 = vsub.f32 %v4263_v47, %v6621_v28  ;;  %v4261_v53 = vld [vmem:[%s7720_s3 + $0xa0] sm:$0xff] }
  0x9b   : > { %5051 = vmatprep.subr.mxu1 %v1596_v54  ;;  %5062 = vmatprep.subr.mxu0 %v6287_v24  ;;  %v6654_v57 = vand.u32 4294901760, %v4261_v53 }
  0x9c   : > { %5041 = vmatmul.mubr.f32.vlgmr.msra.gmra.mxu0 %v1541_v38  ;;  %5052 = vmatpush3.msra.mxu1 %v1596_v54  ;;  %7788 = vst [vmem:[#allocation14_spill] sm:$0xff] %v6636_v52  ;;  %v6648_v38 = vand.u32 4294901760, %v6636_v52 }
  0x9d   : > { %5063 = vmatpush3.msra.mxu0 %v6287_v24  ;;  %5053 = vmatprep.subr.mxu1 %v1603_v56  ;;  %v6534_v24 = vand.u32 4294901760, %v4269_v15 }
  0x9e   : > { %5064 = vmatprep.subr.mxu0 %v6296_v25  ;;  %5054 = vmatpush3.msra.mxu1 %v1603_v56  ;;  %7789 = vst [vmem:[#allocation15_spill] sm:$0xff] %v6648_v38  ;;  %v6651_v56 = vsub.f32 %v4262_v50, %v6638_v20  ;;  %v2255_v60 = vsub.f32 %v6636_v52, %v6648_v38 }
  0x9f   : > { %5065 = vmatpush3.msra.mxu0 %v6296_v25  ;;  %5055 = vmatprep.subr.mxu1 %v1610_v58  ;;  %v2199_v25 = vsub.f32 %v6517_v6, %v6529_v21 }
  0xa0   : > { %5066 = vmatprep.subr.mxu0 %v6311_v29  ;;  %5056 = vmatpush3.msra.mxu1 %v1610_v58  ;;  %7790 = vst [vmem:[#allocation16_spill] sm:$0xff] %v6651_v56  ;;  %v4260_v58 = vld [vmem:[%s7720_s3 + $0x98] sm:$0xff]  ;;  %v6663_v62 = vand.u32 4294901760, %v6651_v56 }
  0xa1   : > { %5067 = vmatpush3.msra.mxu0 %v6311_v29  ;;  %5057 = vmatprep.subr.mxu1 %v1617_v59  ;;  %v2200_v29 = vand.u32 4294901760, %v2199_v25 }
  0xa2   : > { %5068 = vmatprep.subr.mxu0 %v6326_v9  ;;  %5058 = vmatpush3.msra.mxu1 %v1617_v59  ;;  %7791 = vst [vmem:[#allocation17_spill] sm:$0xff] %v6663_v62 }
  0xa3   : > { %5059 = vmatprep.mubr.f32.mxu1 %v6301_v4  ;;  %5069 = vmatpush3.msra.mxu0 %v6326_v9  ;;  %v4266_v9 = vld [vmem:[%s7720_s3 + $0xc8] sm:$0xff] }
  0xa4   : > { %5060 = vmatmul.mubr.f32.vlgmr.msra.gmra.mxu1 %v6316_v5  ;;  %5070 = vmatprep.subr.mxu0 %v6344_v10 }
  0xa5   : > { %5081 = vmatprep.subr.mxu1 %v6271_v12  ;;  %5071 = vmatpush3.msra.mxu0 %v6344_v10  ;;  %v4265_v10 = vld [vmem:[%s7720_s3 + $0xc0] sm:$0xff] }
  0xa6   : > { %5082 = vmatpush3.msra.mxu1 %v6271_v12  ;;  %5072 = vmatprep.subr.mxu0 %v6362_v44 }
  0xa7   : > { %5083 = vmatprep.subr.mxu1 %v6278_v16  ;;  %5073 = vmatpush3.msra.mxu0 %v6362_v44 }
  0xa8   : > { %5084 = vmatpush3.msra.mxu1 %v6278_v16  ;;  %5074 = vmatprep.subr.mxu0 %v6375_v46 }
  0xa9   : > { %5085 = vmatprep.subr.mxu1 %v6284_v22  ;;  %5075 = vmatpush3.msra.mxu0 %v6375_v46 }
  0xaa   : > { %5086 = vmatpush3.msra.mxu1 %v6284_v22  ;;  %5076 = vmatprep.subr.mxu0 %v6388_v17 }
  0xab   : > { %5087 = vmatprep.subr.mxu1 %v6293_v13  ;;  %5077 = vmatpush3.msra.mxu0 %v6388_v17 }
  0xac   : > { %5078 = vmatprep.mubr.f32.mxu0 %v6332_v34  ;;  %5088 = vmatpush3.msra.mxu1 %v6293_v13 }
  0xad   : > { %5079 = vmatmul.mubr.f32.vlgmr.msra.gmra.mxu0 %v6350_v8  ;;  %5089 = vmatprep.subr.mxu1 %v6305_v18 }
  0xae   : > { %5100 = vmatprep.subr.mxu0 %v6308_v14  ;;  %5090 = vmatpush3.msra.mxu1 %v6305_v18 }
  0xaf   : > { %5101 = vmatpush3.msra.mxu0 %v6308_v14  ;;  %5091 = vmatprep.subr.mxu1 %v6320_v32  ;;  %v4267_v14 = vld [vmem:[%s7720_s3 + $0xd0] sm:$0xff] }
  0xb0   : > { %5102 = vmatprep.subr.mxu0 %v6323_v33  ;;  %5092 = vmatpush3.msra.mxu1 %v6320_v32 }
  0xb1   : > { %5103 = vmatpush3.msra.mxu0 %v6323_v33  ;;  %5093 = vmatprep.subr.mxu1 %v6338_v39 }
  0xb2   : > { %5104 = vmatprep.subr.mxu0 %v6341_v40  ;;  %5094 = vmatpush3.msra.mxu1 %v6338_v39 }
  0xb3   : > { %5105 = vmatpush3.msra.mxu0 %v6341_v40  ;;  %5095 = vmatprep.subr.mxu1 %v6356_v41  ;;  %v6579_v40 = vand.u32 4294901760, %v4266_v9 }
  0xb4   : > { %5106 = vmatprep.subr.mxu0 %v6359_v43  ;;  %5096 = vmatpush3.msra.mxu1 %v6356_v41 }
  0xb5   : > { %5097 = vmatprep.mubr.f32.mxu1 %v1529_v7  ;;  %5107 = vmatpush3.msra.mxu0 %v6359_v43  ;;  %v6594_v44 = vsub.f32 %v4266_v9, %v6579_v40  ;;  %v4264_v7 = vld [vmem:[%s7720_s3 + $0xb8] sm:$0xff] }
  0xb6   : > { %5098 = vmatmul.mubr.f32.vlgmr.msra.gmra.mxu1 %v1539_v37  ;;  %5108 = vmatprep.subr.mxu0 %v6372_v45 }
  0xb7   : > { %5119 = vmatprep.subr.mxu1 %v6271_v12  ;;  %5109 = vmatpush3.msra.mxu0 %v6372_v45  ;;  %v6605_v45 = vand.u32 4294901760, %v4264_v7  ;;  %v6609_v37 = vand.u32 4294901760, %v6594_v44 }
  0xb8   : > { %5120 = vmatpush3.msra.mxu1 %v6271_v12  ;;  %5110 = vmatprep.subr.mxu0 %v6385_v49  ;;  %v6519_v12 = vand.u32 4294901760, %v4270_v1 }
  0xb9   : > { %5121 = vmatprep.subr.mxu1 %v6278_v16  ;;  %5111 = vmatpush3.msra.mxu0 %v6385_v49  ;;  %7785 = vst [vmem:[#allocation11_spill] sm:$0xff] %v6609_v37  ;;  %v6619_v17 = vsub.f32 %v4264_v7, %v6605_v45  ;;  %v2234_v42 = vsub.f32 %v6594_v44, %v6609_v37 }
  0xba   : > { %5122 = vmatpush3.msra.mxu1 %v6278_v16  ;;  %5112 = vmatprep.subr.mxu0 %v6399_v51  ;;  %v2192_v16 = vsub.f32 %v6504_v63, %v6514_v2 }
  0xbb   : > { %5123 = vmatprep.subr.mxu1 %v6284_v22  ;;  %5113 = vmatpush3.msra.mxu0 %v6399_v51  ;;  %v6633_v30 = vand.u32 4294901760, %v6619_v17 }
  0xbc   : > { %5124 = vmatpush3.msra.mxu1 %v6284_v22  ;;  %5114 = vmatprep.subr.mxu0 %v6409_v36  ;;  %v6532_v22 = vsub.f32 %v4270_v1, %v6519_v12  ;;  %v6665_v1 = vand.u32 4294901760, %v4260_v58 }
  0xbd   : > { %5125 = vmatprep.subr.mxu1 %v6293_v13  ;;  %5115 = vmatpush3.msra.mxu0 %v6409_v36  ;;  %7787 = vst [vmem:[#allocation13_spill] sm:$0xff] %v6633_v30  ;;  %v2235_v36 = vand.u32 4294901760, %v2234_v42  ;;  %v2248_v55 = vsub.f32 %v6619_v17, %v6633_v30 }
  0xbe   : > { %5116 = vmatprep.mubr.f32.mxu0 %v6301_v4  ;;  %5126 = vmatpush3.msra.mxu1 %v6293_v13  ;;  %v2193_v13 = vand.u32 4294901760, %v2192_v16  ;;  %v6544_v27 = vand.u32 4294901760, %v6532_v22  ;;  %7792 = vst [vmem:[#allocation18_spill] sm:$0xff] %v6665_v1  ;;  %v4259_v16 = vld [vmem:[%s7720_s3 + $0x90] sm:$0xff]  ;;  %v6678_v25 = vsub.f32 %v4260_v58, %v6665_v1 }
  0xbf   : > { %5117 = vmatmul.mubr.f32.vlgmr.msra.gmra.mxu0 %v6316_v5  ;;  %5127 = vmatprep.subr.mxu1 %v6305_v18  ;;  %v2249_v59 = vand.u32 4294901760, %v2248_v55 }
  0xc0   : > { %5128 = vmatpush3.msra.mxu1 %v6305_v18  ;;  %5135 = vmatprep.mubr.f32.mxu1 %v6301_v4  ;;  %7781 = vst [vmem:[#allocation7_spill] sm:$0xff] %v6544_v27  ;;  %v6547_v4 = vsub.f32 %v4269_v15, %v6534_v24  ;;  %v6550_v18 = vand.u32 4294901760, %v4268_v3  ;;  %v2206_v23 = vsub.f32 %v6532_v22, %v6544_v27  ;;  %7794 = vst [vmem:[#allocation20_spill] sm:$0xff] %v6678_v25 }
  0xc1   : > { %5129 = vmatprep.subr.mxu1 %v6320_v32  ;;  %5138 = vmatprep.subr.mxu0 %v6498_v61  ;;  %v6669_v15 = vsub.f32 %v4261_v53, %v6654_v57 }
  0xc2   : > { %5130 = vmatpush3.msra.mxu1 %v6320_v32  ;;  %5139 = vmatpush3.msra.mxu0 %v6498_v61  ;;  %v6561_v32 = vand.u32 4294901760, %v4267_v14  ;;  %v6564_v33 = vsub.f32 %v4268_v3, %v6550_v18  ;;  %v2207_v26 = vand.u32 4294901760, %v2206_v23  ;;  %v2256_v3 = vand.u32 4294901760, %v2255_v60  ;;  %v4258_v23 = vld [vmem:[%s7720_s3 + $0x88] sm:$0xff] }
  0xc3   : > { %5131 = vmatprep.subr.mxu1 %v6338_v39  ;;  %5140 = vmatprep.subr.mxu0 %v6506_v0  ;;  %7793 = vst [vmem:[#allocation19_spill] sm:$0xff] %v6669_v15 }
  0xc4   : > { %5132 = vmatpush3.msra.mxu1 %v6338_v39  ;;  %5141 = vmatpush3.msra.mxu0 %v6506_v0  ;;  %v6573_v35 = vsub.f32 %v4267_v14, %v6561_v32  ;;  %v6577_v39 = vand.u32 4294901760, %v6564_v33  ;;  %v6680_v14 = vand.u32 4294901760, %v4259_v16 }
  0xc5   : > { %5133 = vmatprep.subr.mxu1 %v6356_v41  ;;  %5142 = vmatprep.subr.mxu0 %v6519_v12 }
  0xc6   : > { %5134 = vmatpush3.msra.mxu1 %v6356_v41  ;;  %5143 = vmatpush3.msra.mxu0 %v6519_v12  ;;  %7783 = vst [vmem:[#allocation9_spill] sm:$0xff] %v6577_v39  ;;  %v6586_v19 = vand.u32 4294901760, %v6573_v35  ;;  %v6588_v41 = vand.u32 4294901760, %v4265_v10  ;;  %v2220_v43 = vsub.f32 %v6564_v33, %v6577_v39  ;;  %7795 = vst [vmem:[#allocation21_spill] sm:$0xff] %v6680_v14 }
  0xc7   : > { %5136 = vmatmul.mubr.f32.vlgmr.msra.gmra.mxu1 %v6316_v5  ;;  %5144 = vmatprep.subr.mxu0 %v6534_v24  ;;  %v6559_v5 = vand.u32 4294901760, %v6547_v4 }
  0xc8   : > { %5145 = vmatpush3.msra.mxu0 %v6534_v24  ;;  %5173 = vmatprep.subr.mxu1 %v2193_v13  ;;  %7784 = vst [vmem:[#allocation10_spill] sm:$0xff] %v6586_v19  ;;  %v2227_v31 = vsub.f32 %v6573_v35, %v6586_v19  ;;  %v6603_v11 = vsub.f32 %v4265_v10, %v6588_v41  ;;  %v2221_v46 = vand.u32 4294901760, %v2220_v43  ;;  %v6696_v10 = vand.u32 4294901760, %v4258_v23  ;;  %v4257_v43 = vld [vmem:[%s7720_s3 + $0x80] sm:$0xff] }
  0xc9   : > { %7782 = vst [vmem:[#allocation8_spill] sm:$0xff] %v6559_v5  ;;  %5174 = vmatpush3.msra.mxu1 %v2193_v13  ;;  %5146 = vmatprep.subr.mxu0 %v6550_v18  ;;  %v2213_v34 = vsub.f32 %v6547_v4, %v6559_v5  ;;  %v2262_v13 = vsub.f32 %v6651_v56, %v6663_v62 }
  0xca   : > { %5175 = vmatprep.subr.mxu1 %v2200_v29  ;;  %5147 = vmatpush3.msra.mxu0 %v6550_v18  ;;  %v2228_v48 = vand.u32 4294901760, %v2227_v31  ;;  %v6616_v49 = vand.u32 4294901760, %v6603_v11  ;;  %7799 = vst [vmem:[#allocation25_spill] sm:$0xff] %v6696_v10 }
  0xcb   : > { %5176 = vmatpush3.msra.mxu1 %v2200_v29  ;;  %5148 = vmatprep.subr.mxu0 %v6561_v32  ;;  %v2214_v8 = vand.u32 4294901760, %v2213_v34  ;;  %v6684_v29 = vand.u32 4294901760, %v6669_v15  ;;  %v2263_v9 = vand.u32 4294901760, %v2262_v13  ;;  %v6694_v34 = vsub.f32 %v4259_v16, %v6680_v14 }
  0xcc   : > { %5177 = vmatprep.subr.mxu1 %v2207_v26  ;;  %5149 = vmatpush3.msra.mxu0 %v6561_v32  ;;  %7786 = vst [vmem:[#allocation12_spill] sm:$0xff] %v6616_v49  ;;  %v2241_v51 = vsub.f32 %v6603_v11, %v6616_v49 }
  0xcd   : > { %5178 = vmatpush3.msra.mxu1 %v2207_v26  ;;  %5150 = vmatprep.subr.mxu0 %v6579_v40  ;;  %7796 = vst [vmem:[#allocation22_spill] sm:$0xff] %v6684_v29  ;;  %v6691_v26 = vand.u32 4294901760, %v6678_v25  ;;  %7798 = vst [vmem:[#allocation24_spill] sm:$0xff] %v6694_v34  ;;  %v6708_v31 = vand.u32 4294901760, %v6694_v34 }
  0xce   : > { %5179 = vmatprep.subr.mxu1 %v2214_v8  ;;  %5151 = vmatpush3.msra.mxu0 %v6579_v40  ;;  %v2242_v54 = vand.u32 4294901760, %v2241_v51 }
  0xcf   : > { %5180 = vmatpush3.msra.mxu1 %v2214_v8  ;;  %5152 = vmatprep.subr.mxu0 %v6588_v41  ;;  %7797 = vst [vmem:[#allocation23_spill] sm:$0xff] %v6691_v26  ;;  %v2269_v8 = vsub.f32 %v6669_v15, %v6684_v29  ;;  %v2276_v7 = vsub.f32 %v6678_v25, %v6691_v26  ;;  %7800 = vst [vmem:[#allocation26_spill] sm:$0xff] %v6708_v31 }
  0xd0   : > { %5153 = vmatpush3.msra.mxu0 %v6588_v41  ;;  %5181 = vmatprep.subr.mxu1 %v2221_v46  ;;  %v2283_v50 = vsub.f32 %v6694_v34, %v6708_v31 }
  0xd1   : > { %5154 = vmatprep.subr.mxu0 %v6605_v45  ;;  %5182 = vmatpush3.msra.mxu1 %v2221_v46  ;;  %v6711_v46 = vsub.f32 %v4258_v23, %v6696_v10  ;;  %v2270_v47 = vand.u32 4294901760, %v2269_v8  ;;  %v2277_v42 = vand.u32 4294901760, %v2276_v7 }
  0xd2   : > { %5155 = vmatpush3.msra.mxu0 %v6605_v45  ;;  %5183 = vmatprep.subr.mxu1 %v2228_v48  ;;  %v2284_v53 = vand.u32 4294901760, %v2283_v50 }
  0xd3   : > { %5156 = vmatprep.subr.mxu0 %v6621_v28  ;;  %5184 = vmatpush3.msra.mxu1 %v2228_v48  ;;  %7801 = vst [vmem:[#allocation27_spill] sm:$0xff] %v6711_v46  ;;  %v6714_v48 = vand.u32 4294901760, %v4257_v43  ;;  %v6720_v51 = vand.u32 4294901760, %v6711_v46 }
  0xd4   : > { %5157 = vmatpush3.msra.mxu0 %v6621_v28  ;;  %5185 = vmatprep.subr.mxu1 %v2235_v36 }
  0xd5   : > { %5158 = vmatprep.subr.mxu0 %v6638_v20  ;;  %5186 = vmatpush3.msra.mxu1 %v2235_v36  ;;  %7802 = vst [vmem:[#allocation28_spill] sm:$0xff] %v6714_v48  ;;  %7803 = vst [vmem:[#allocation29_spill] sm:$0xff] %v6720_v51  ;;  %v6724_v36 = vsub.f32 %v4257_v43, %v6714_v48 }
  0xd6   : > { %5159 = vmatpush3.msra.mxu0 %v6638_v20  ;;  %5187 = vmatprep.subr.mxu1 %v2242_v54 }
  0xd7   : > { %5160 = vmatprep.subr.mxu0 %v6654_v57  ;;  %5188 = vmatpush3.msra.mxu1 %v2242_v54  ;;  %7804 = vst [vmem:[#allocation30_spill] sm:$0xff] %v6724_v36  ;;  %v2290_v54 = vsub.f32 %v6711_v46, %v6720_v51  ;;  %v6731_v55 = vand.u32 4294901760, %v6724_v36 }
  0xd8   : > { %5161 = vmatpush3.msra.mxu0 %v6654_v57  ;;  %5189 = vmatprep.subr.mxu1 %v2249_v59 }
  0xd9   : > { %5162 = vmatprep.subr.mxu0 %v6665_v1  ;;  %5190 = vmatpush3.msra.mxu1 %v2249_v59  ;;  %7805 = vst [vmem:[#allocation31_spill] sm:$0xff] %v6731_v55  ;;  %v2291_v58 = vand.u32 4294901760, %v2290_v54  ;;  %v2297_v59 = vsub.f32 %v6724_v36, %v6731_v55 }
  0xda   : > { %5163 = vmatpush3.msra.mxu0 %v6665_v1  ;;  %5191 = vmatprep.subr.mxu1 %v2256_v3 }
  0xdb   : > { %5164 = vmatprep.subr.mxu0 %v6680_v14  ;;  %5192 = vmatpush3.msra.mxu1 %v2256_v3  ;;  %v2298_v60 = vand.u32 4294901760, %v2297_v59 }
  0xdc   : > { %5165 = vmatpush3.msra.mxu0 %v6680_v14  ;;  %5193 = vmatprep.subr.mxu1 %v2263_v9 }
  0xdd   : > { %5166 = vmatprep.subr.mxu0 %v6696_v10  ;;  %5194 = vmatpush3.msra.mxu1 %v2263_v9 }
  0xde   : > { %5167 = vmatpush3.msra.mxu0 %v6696_v10  ;;  %5195 = vmatprep.subr.mxu1 %v2270_v47 }
  0xdf   : > { %5168 = vmatprep.subr.mxu0 %v6714_v48  ;;  %5196 = vmatpush3.msra.mxu1 %v2270_v47 }
  0xe0   : > { %5169 = vmatpush3.msra.mxu0 %v6714_v48  ;;  %5197 = vmatprep.subr.mxu1 %v2277_v42 }
  0xe1   : > { %5208 = vmatprep.subr.mxu0 %v6504_v63  ;;  %5198 = vmatpush3.msra.mxu1 %v2277_v42 }
  0xe2   : > { %5199 = vmatprep.subr.mxu1 %v2284_v53 }
  0xe3   : > { %5200 = vmatpush3.msra.mxu1 %v2284_v53 }
  0xe4   : > { %5201 = vmatprep.subr.mxu1 %v2291_v58 }
  0xe5   : > { %5202 = vmatpush3.msra.mxu1 %v2291_v58 }
  0xe6   : > { %5203 = vmatprep.subr.mxu1 %v2298_v60 }
  0xe7   : > { %5204 = vmatpush3.msra.mxu1 %v2298_v60 }
  0xe8   : > { %5243 = vmatprep.subr.mxu1 %v6498_v61 }
  0xf1   : > { %v4814_v16 = vpop.f32.mrf.mxu0 }
  0xf3   : > { %v352_v3 = vpop.f32.mrf.mxu0 }
  0xf7   : > { %v4833_v13 = vpop.f32.mrf.mxu1 }
  0xf8   : > { %v480_v30 = vadd.f32 %v4833_v13, %v4814_v16 }
  0xf9   : > { %v473_v9 = vpop.f32.mrf.mxu1 }
  0xfa   : > { %v474_v37 = vadd.f32 %v473_v9, %v352_v3 }
 0x101   : > { %v4852_v23 = vpop.f32.mrf.mxu0 }
 0x102   : > { %v575_v19 = vadd.f32 %v4852_v23, %v480_v30 }
 0x103   : > { %v567_v8 = vpop.f32.mrf.mxu0 }
 0x104   : > { %v568_v5 = vadd.f32 %v567_v8, %v474_v37 }
 0x10a   : > { %v4871_v43 = vpop.f32.mrf.mxu1 }
 0x10b   : > { %v664_v27 = vadd.f32 %v4871_v43, %v575_v19 }
 0x10c   : > { %v655_v47 = vpop.f32.mrf.mxu1 }
 0x10d   : > { %v656_v36 = vadd.f32 %v655_v47, %v568_v5 }
 0x113   : > { %v4890_v7 = vpop.f32.mrf.mxu0 }
 0x114   : > { %v765_v46 = vadd.f32 %v4890_v7, %v664_v27 }
 0x115   : > { %v758_v42 = vpop.f32.mrf.mxu0 }
 0x116   : > { %v759_v25 = vadd.f32 %v758_v42, %v656_v36 }
 0x11c   : > { %v4909_v50 = vpop.f32.mrf.mxu1 }
 0x11d   : > { %v850_v48 = vadd.f32 %v4909_v50, %v765_v46 }
 0x11e   : > { %v843_v53 = vpop.f32.mrf.mxu1 }
 0x11f   : > { %v844_v10 = vadd.f32 %v843_v53, %v759_v25 }
 0x125   : > { %v4928_v54 = vpop.f32.mrf.mxu0 }
 0x126   : > { %v947_v56 = vadd.f32 %v4928_v54, %v850_v48 }
 0x127   : > { %v936_v55 = vpop.f32.mrf.mxu0 }
 0x128   : > { %v937_v1 = vadd.f32 %v936_v55, %v844_v10 }
 0x12e   : > { %v4947_v59 = vpop.f32.mrf.mxu1 }
 0x12f   : > { %v1064_v16 = vadd.f32 %v4947_v59, %v947_v56 }
 0x130   : > { %v1057_v51 = vpop.f32.mrf.mxu1 }
 0x131   : > { %v1058_v30 = vadd.f32 %v1057_v51, %v937_v1 }
 0x137   : > { %v4966_v58 = vpop.f32.mrf.mxu0 }
 0x138   : > { %v1159_v23 = vadd.f32 %v4966_v58, %v1064_v16 }
 0x139   : > { %v1151_v60 = vpop.f32.mrf.mxu0 }
 0x13a   : > { %v1152_v8 = vadd.f32 %v1151_v60, %v1058_v30 }
 0x140   : > { %v4985_v31 = vpop.f32.mrf.mxu1 }
 0x141   : > { %v1248_v5 = vadd.f32 %v4985_v31, %v1159_v23 }
 0x142   : > { %v1239_v29 = vpop.f32.mrf.mxu1 }
 0x143   : > { %v1240_v46 = vadd.f32 %v1239_v29, %v1152_v8  ;;  %v7820_v8 = vld [vmem:[#allocation8_spill] sm:$0xff] }
 0x149   : > { %v5004_v26 = vpop.f32.mrf.mxu0 }
 0x14a   : > { %v1349_v7 = vadd.f32 %v5004_v26, %v1248_v5  ;;  %v7821_v5 = vld [vmem:[#allocation9_spill] sm:$0xff] }
 0x14b   : > { %v1342_v62 = vpop.f32.mrf.mxu0 }
 0x14c   : > { %v1343_v42 = vadd.f32 %v1342_v62, %v1240_v46  ;;  %v2058_v46 = vld [vmem:[%s7720_s3 + $0x58] sm:$0xff] }
 0x152   : > { %v5023_v38 = vpop.f32.mrf.mxu1 }
 0x153   : > { %v1434_v10 = vadd.f32 %v5023_v38, %v1349_v7  ;;  %v7823_v7 = vld [vmem:[#allocation11_spill] sm:$0xff] }
 0x154   : > { %v1427_v39 = vpop.f32.mrf.mxu1 }
 0x155   : > { %v1428_v1 = vadd.f32 %v1427_v39, %v1343_v42 }
 0x15c   : > { %v5042_v49 = vpop.f32.mrf.mxu0 }
 0x15e   : > { %v1533_v21 = vpop.f32.mrf.mxu0 }
 0x164   : > { %v5061_v2 = vpop.f32.mrf.mxu1 }
 0x165   : > { %v1661_v13 = vadd.f32 %v5061_v2, %v5042_v49 }
 0x166   : > { %v1654_v15 = vpop.f32.mrf.mxu1 }
 0x167   : > { %v1655_v37 = vadd.f32 %v1654_v15, %v1533_v21  ;;  %v4256_v21 = vld [vmem:[%s7719_s2] ss:$0 sm:$0xff] }
 0x16d   : > { %v5080_v34 = vpop.f32.mrf.mxu0 }
 0x16e   : > { %v1756_v19 = vadd.f32 %v5080_v34, %v1661_v13 }
 0x16f   : > { %v1748_v14 = vpop.f32.mrf.mxu0 }
 0x170   : > { %v1749_v27 = vadd.f32 %v1748_v14, %v1655_v37  ;;  %v7815_v37 = vld [vmem:[#allocation27_spill] sm:$0xff] }
 0x176   : > { %v5099_v52 = vpop.f32.mrf.mxu1 }
 0x177   : > { %v1845_v43 = vadd.f32 %v5099_v52, %v1756_v19  ;;  %v7816_v19 = vld [vmem:[#allocation30_spill] sm:$0xff] }
 0x178   : > { %v1836_v9 = vpop.f32.mrf.mxu1 }
 0x179   : > { %v1837_v25 = vadd.f32 %v1836_v9, %v1749_v27 }
 0x17f   : > { %v5118_v3 = vpop.f32.mrf.mxu0 }
 0x180   : > { %v1946_v48 = vadd.f32 %v5118_v3, %v1845_v43  ;;  %v2059_v43 = vld [vmem:[%s7720_s3 + $0x60] sm:$0xff] }
 0x181   : > { %v1939_v36 = vpop.f32.mrf.mxu0 }
 0x182   : > { %v1940_v56 = vadd.f32 %v1939_v36, %v1837_v25  ;;  %v7822_v36 = vld [vmem:[#allocation10_spill] sm:$0xff] }
 0x187   : > { %v5137_v47 = vpop.f32.mrf.mxu1 }
 0x188   : > { %v2031_v2 = vadd.f32 %v5137_v47, %v1946_v48  ;;  %v2057_v47 = vld [vmem:[%s7720_s3 + $0x50] sm:$0xff] }
 0x189   : > { %v2024_v49 = vpop.f32.mrf.mxu1 }
 0x18a   : > { %v2035_v15 = vadd.f32 %v2031_v2, %v1434_v10  ;;  %v2025_v34 = vadd.f32 %v2024_v49, %v1940_v56  ;;  %v6911_v10 = vand.u32 4294901760, %v2058_v46  ;;  %v2056_v56 = vld [vmem:[%s7720_s3 + $0x48] sm:$0xff]  ;;  %v7825_v2 = vld [vmem:[#allocation13_spill] sm:$0xff]  ;;  %v6926_v49 = vand.u32 4294901760, %v2057_v47 }
 0x18c   : > { %v2044_v14 = vadd.f32 %v4256_v21, %v2035_v15  ;;  %v2034_v52 = vadd.f32 %v2025_v34, %v1428_v1  ;;  %v7826_v34 = vld [vmem:[#allocation15_spill] sm:$0xff] }
 0x18e   : > { %v6740_v31 = vmax.f32 %v2044_v14, 0.0  ;;  %v2043_v29 = vadd.f32 %v4256_v21, %v2034_v52  ;;  %v6944_v52 = vsub.f32 %v2058_v46, %v6911_v10 }
 0x190   : > { %v6742_v26 = vmax.f32 %v2043_v29, 0.0  ;;  %v2083_v62 = vrot.slane %v6740_v31, 1  ;;  %v6750_v50 = vrot.slane %v6740_v31, 2  ;;  %v6946_v29 = vand.u32 4294901760, %v2056_v56 }
 0x192   : > { %v2082_v38 = vrot.slane %v6742_v26, 1  ;;  %v6746_v51 = vand.u32 4294901760, %v2083_v62  ;;  %v3472_v55 = vrot.slane %v6742_v26, 2  ;;  %v6933_v15 = vand.u32 4294901760, %v6742_v26 }
 0x194   : > { %v2084_v39 = vsel %vm264_vm0, %v2082_v38, %v2083_v62  ;;  %v6754_v54 = vsub.f32 %v2083_v62, %v6746_v51  ;;  %v6760_v59 = vsel %vm1446_vm2, %v3472_v55, %v6750_v50  ;;  %v7827_v62 = vld [vmem:[#allocation17_spill] sm:$0xff] }
 0x195   : > { %v6756_v53 = vand.u32 4294901760, %v2084_v39 }
 0x196   : > { %v2180_v58 = vand.u32 4294901760, %v6754_v54 }
 0x197   : > { %5205 = vmatprep.mubr.f32.mxu1 %v6756_v53  ;;  %v2169_v60 = vsub.f32 %v2084_v39, %v6756_v53  ;;  %v6958_v39 = vsub.f32 %v2057_v47, %v6926_v49 }
 0x198   : > { %5206 = vmatmul.mubr.f32.vlgmr.msra.gmra.mxu1 %v6746_v51  ;;  %v2181_v13 = vsub.f32 %v6754_v54, %v2180_v58 }
 0x199   : > { %5244 = vmatpush3.msra.mxu1 %v6498_v61  ;;  %v2170_v16 = vand.u32 4294901760, %v2169_v60 }
 0x19a   : > { %5245 = vmatprep.subr.mxu1 %v6506_v0  ;;  %v2182_v23 = vand.u32 4294901760, %v2181_v13 }
 0x19b   : > { %5246 = vmatpush3.msra.mxu1 %v6506_v0  ;;  %5275 = vmatprep.mubr.f32.mxu1 %v2170_v16  ;;  %v2171_v3 = vsub.f32 %v2169_v60, %v2170_v16  ;;  %v7828_v16 = vld [vmem:[#allocation22_spill] sm:$0xff] }
 0x19c   : > { %5247 = vmatprep.subr.mxu1 %v6519_v12 }
 0x19d   : > { %5248 = vmatpush3.msra.mxu1 %v6519_v12  ;;  %v2172_v30 = vand.u32 4294901760, %v2171_v3  ;;  %v6976_v3 = vand.u32 4294901760, %v6944_v52 }
 0x19e   : > { %5249 = vmatprep.subr.mxu1 %v6534_v24 }
 0x19f   : > { %5250 = vmatpush3.msra.mxu1 %v6534_v24  ;;  %5170 = vmatprep.mubr.f32.mxu0 %v2172_v30  ;;  %v6979_v30 = vsub.f32 %v2056_v56, %v6946_v29  ;;  %v2049_v56 = vld [vmem:[%s7720_s3 + $0x10] sm:$0xff] }
 0x1a0   : > { %5251 = vmatprep.subr.mxu1 %v6550_v18  ;;  %5171 = vmatmul.mubr.f32.vlgmr.msra.gmra.mxu0 %v2182_v23  ;;  %v2053_v23 = vld [vmem:[%s7720_s3 + $0x30] sm:$0xff] }
 0x1a1   : > { %5209 = vmatpush3.msra.mxu0 %v6504_v63  ;;  %5252 = vmatpush3.msra.mxu1 %v6550_v18  ;;  %v7806_v63 = vld [vmem:[#allocation18_spill] sm:$0xff] }
 0x1a2   : > { %5210 = vmatprep.subr.mxu0 %v6517_v6  ;;  %5240 = vmatprep.mubr.f32.mxu0 %v2169_v60  ;;  %v6969_v60 = vsub.f32 %v6742_v26, %v6933_v15 }
 0x1a3   : > { %5253 = vmatprep.subr.mxu1 %v6561_v32  ;;  %5211 = vmatpush3.msra.mxu0 %v6517_v6  ;;  %v7807_v6 = vld [vmem:[#allocation14_spill] sm:$0xff] }
 0x1a4   : > { %5254 = vmatpush3.msra.mxu1 %v6561_v32  ;;  %5212 = vmatprep.subr.mxu0 %v6532_v22 }
 0x1a5   : > { %5255 = vmatprep.subr.mxu1 %v6579_v40  ;;  %5213 = vmatpush3.msra.mxu0 %v6532_v22  ;;  %v7808_v22 = vld [vmem:[#allocation21_spill] sm:$0xff] }
 0x1a6   : > { %5256 = vmatpush3.msra.mxu1 %v6579_v40  ;;  %5214 = vmatprep.subr.mxu0 %v6547_v4 }
 0x1a7   : > { %5257 = vmatprep.subr.mxu1 %v6588_v41  ;;  %5215 = vmatpush3.msra.mxu0 %v6547_v4  ;;  %v7809_v4 = vld [vmem:[#allocation16_spill] sm:$0xff] }
 0x1a8   : > { %5258 = vmatpush3.msra.mxu1 %v6588_v41  ;;  %5216 = vmatprep.subr.mxu0 %v6564_v33 }
 0x1a9   : > { %5259 = vmatprep.subr.mxu1 %v6605_v45  ;;  %5217 = vmatpush3.msra.mxu0 %v6564_v33  ;;  %v7810_v33 = vld [vmem:[#allocation25_spill] sm:$0xff] }
 0x1aa   : > { %5260 = vmatpush3.msra.mxu1 %v6605_v45  ;;  %5218 = vmatprep.subr.mxu0 %v6573_v35 }
 0x1ab   : > { %5261 = vmatprep.subr.mxu1 %v6621_v28  ;;  %5219 = vmatpush3.msra.mxu0 %v6573_v35  ;;  %v7811_v35 = vld [vmem:[#allocation19_spill] sm:$0xff] }
 0x1ac   : > { %5262 = vmatpush3.msra.mxu1 %v6621_v28  ;;  %5220 = vmatprep.subr.mxu0 %v6594_v44 }
 0x1ad   : > { %5263 = vmatprep.subr.mxu1 %v6638_v20  ;;  %5221 = vmatpush3.msra.mxu0 %v6594_v44  ;;  %v7812_v44 = vld [vmem:[#allocation28_spill] sm:$0xff] }
 0x1ae   : > { %5264 = vmatpush3.msra.mxu1 %v6638_v20  ;;  %5222 = vmatprep.subr.mxu0 %v6603_v11 }
 0x1af   : > { %5265 = vmatprep.subr.mxu1 %v6654_v57  ;;  %5223 = vmatpush3.msra.mxu0 %v6603_v11  ;;  %v7813_v11 = vld [vmem:[#allocation20_spill] sm:$0xff] }
 0x1b0   : > { %5266 = vmatpush3.msra.mxu1 %v6654_v57  ;;  %5224 = vmatprep.subr.mxu0 %v6619_v17 }
 0x1b1   : > { %5267 = vmatprep.subr.mxu1 %v7806_v63  ;;  %5225 = vmatpush3.msra.mxu0 %v6619_v17  ;;  %v7814_v17 = vld [vmem:[#allocation24_spill] sm:$0xff] }
 0x1b2   : > { %5268 = vmatpush3.msra.mxu1 %v7806_v63  ;;  %5226 = vmatprep.subr.mxu0 %v7807_v6 }
 0x1b3   : > { %5269 = vmatprep.subr.mxu1 %v7808_v22  ;;  %5227 = vmatpush3.msra.mxu0 %v7807_v6 }
 0x1b4   : > { %5270 = vmatpush3.msra.mxu1 %v7808_v22  ;;  %5228 = vmatprep.subr.mxu0 %v7809_v4 }
 0x1b5   : > { %5271 = vmatprep.subr.mxu1 %v7810_v33  ;;  %5229 = vmatpush3.msra.mxu0 %v7809_v4  ;;  %v6993_v4 = vand.u32 4294901760, %v6958_v39 }
 0x1b6   : > { %5272 = vmatpush3.msra.mxu1 %v7810_v33  ;;  %5230 = vmatprep.subr.mxu0 %v7811_v35 }
 0x1b7   : > { %5273 = vmatprep.subr.mxu1 %v7812_v44  ;;  %5231 = vmatpush3.msra.mxu0 %v7811_v35  ;;  %v2052_v35 = vld [vmem:[%s7720_s3 + $0x28] sm:$0xff] }
 0x1b8   : > { %5274 = vmatpush3.msra.mxu1 %v7812_v44  ;;  %5232 = vmatprep.subr.mxu0 %v7813_v11 }
 0x1b9   : > { %5276 = vmatmul.mubr.f32.vlgmr.msra.gmra.mxu1 %v2180_v58  ;;  %5313 = vmatprep.subr.mxu1 %v6498_v61 }
 0x1ba   : > { %5233 = vmatpush3.msra.mxu0 %v7813_v11  ;;  %5314 = vmatpush3.msra.mxu1 %v6498_v61  ;;  %v7817_v61 = vld [vmem:[#allocation5_spill] sm:$0xff]  ;;  %v7003_v11 = vand.u32 4294901760, %v2053_v23 }
 0x1bb   : > { %5345 = vmatprep.mubr.f32.mxu1 %v6756_v53  ;;  %5234 = vmatprep.subr.mxu0 %v7814_v17 }
 0x1bc   : > { %5315 = vmatprep.subr.mxu1 %v6506_v0  ;;  %5235 = vmatpush3.msra.mxu0 %v7814_v17  ;;  %v7035_v46 = vsub.f32 %v2053_v23, %v7003_v11  ;;  %v7067_v23 = vand.u32 4294901760, %v2049_v56 }
 0x1bd   : > { %5316 = vmatpush3.msra.mxu1 %v6506_v0  ;;  %5236 = vmatprep.subr.mxu0 %v7815_v37  ;;  %v7818_v0 = vld [vmem:[#allocation6_spill] sm:$0xff] }
 0x1be   : > { %5317 = vmatprep.subr.mxu1 %v6519_v12  ;;  %5237 = vmatpush3.msra.mxu0 %v7815_v37  ;;  %v2904_v37 = vsub.f32 %v6944_v52, %v6976_v3 }
 0x1bf   : > { %5318 = vmatpush3.msra.mxu1 %v6519_v12  ;;  %5238 = vmatprep.subr.mxu0 %v7816_v19  ;;  %v2062_v12 = vld [vmem:[%s7720_s3 + $0x78] sm:$0xff] }
 0x1c0   : > { %5319 = vmatprep.subr.mxu1 %v6534_v24  ;;  %5239 = vmatpush3.msra.mxu0 %v7816_v19  ;;  %v6858_v9 = vand.u32 4294901760, %v2062_v12  ;;  %v7009_v19 = vand.u32 4294901760, %v6979_v30  ;;  %v2905_v47 = vand.u32 4294901760, %v2904_v37 }
 0x1c1   : > { %5320 = vmatpush3.msra.mxu1 %v6534_v24  ;;  %5241 = vmatmul.mubr.f32.vlgmr.msra.gmra.mxu0 %v6754_v54  ;;  %v7819_v24 = vld [vmem:[#allocation7_spill] sm:$0xff] }
 0x1c2   : > { %5278 = vmatprep.subr.mxu0 %v7817_v61  ;;  %5321 = vmatprep.subr.mxu1 %v6550_v18 }
 0x1c3   : > { %5279 = vmatpush3.msra.mxu0 %v7817_v61  ;;  %5310 = vmatprep.mubr.f32.mxu0 %v6756_v53  ;;  %v2054_v53 = vld [vmem:[%s7720_s3 + $0x38] sm:$0xff]  ;;  %v2051_v61 = vld [vmem:[%s7720_s3 + $0x20] sm:$0xff] }
 0x1c4   : > { %5322 = vmatpush3.msra.mxu1 %v6550_v18  ;;  %5280 = vmatprep.subr.mxu0 %v7818_v0  ;;  %v2061_v18 = vld [vmem:[%s7720_s3 + $0x70] sm:$0xff]  ;;  %v6986_v26 = vand.u32 4294901760, %v2054_v53 }
 0x1c5   : > { %5323 = vmatprep.subr.mxu1 %v6561_v32  ;;  %5281 = vmatpush3.msra.mxu0 %v7818_v0  ;;  %v6872_v27 = vand.u32 4294901760, %v2061_v18  ;;  %v7830_v0 = vld [vmem:[#allocation26_spill] sm:$0xff] }
 0x1c6   : > { %5324 = vmatpush3.msra.mxu1 %v6561_v32  ;;  %5282 = vmatprep.subr.mxu0 %v7819_v24  ;;  %v2060_v32 = vld [vmem:[%s7720_s3 + $0x68] sm:$0xff] }
 0x1c7   : > { %5325 = vmatprep.subr.mxu1 %v6579_v40  ;;  %5283 = vmatpush3.msra.mxu0 %v7819_v24  ;;  %v6894_v25 = vsub.f32 %v2061_v18, %v6872_v27  ;;  %v7019_v24 = vand.u32 4294901760, %v2052_v35 }
 0x1c8   : > { %5326 = vmatpush3.msra.mxu1 %v6579_v40  ;;  %5284 = vmatprep.subr.mxu0 %v7820_v8  ;;  %v6877_v40 = vsub.f32 %v2062_v12, %v6858_v9  ;;  %v7017_v12 = vsub.f32 %v2054_v53, %v6986_v26  ;;  %v2048_v53 = vld [vmem:[%s7720_s3 + $0x8] sm:$0xff] }
 0x1c9   : > { %5327 = vmatprep.subr.mxu1 %v6588_v41  ;;  %5285 = vmatpush3.msra.mxu0 %v7820_v8  ;;  %v2911_v8 = vsub.f32 %v6958_v39, %v6993_v4 }
 0x1ca   : > { %5328 = vmatpush3.msra.mxu1 %v6588_v41  ;;  %5286 = vmatprep.subr.mxu0 %v7821_v5  ;;  %v6884_v41 = vand.u32 4294901760, %v2060_v32  ;;  %v6901_v48 = vand.u32 4294901760, %v6877_v40 }
 0x1cb   : > { %5329 = vmatprep.subr.mxu1 %v6605_v45  ;;  %5287 = vmatpush3.msra.mxu0 %v7821_v5  ;;  %v2050_v5 = vld [vmem:[%s7720_s3 + $0x18] sm:$0xff] }
 0x1cc   : > { %5330 = vmatpush3.msra.mxu1 %v6605_v45  ;;  %5288 = vmatprep.subr.mxu0 %v7822_v36  ;;  %v6896_v45 = vand.u32 4294901760, %v2059_v43  ;;  %v6909_v42 = vsub.f32 %v2060_v32, %v6884_v41  ;;  %v2876_v1 = vsub.f32 %v6877_v40, %v6901_v48 }
 0x1cd   : > { %5331 = vmatprep.subr.mxu1 %v6621_v28  ;;  %5289 = vmatpush3.msra.mxu0 %v7822_v36 }
 0x1ce   : > { %5332 = vmatpush3.msra.mxu1 %v6621_v28  ;;  %5290 = vmatprep.subr.mxu0 %v7823_v7  ;;  %v7824_v28 = vld [vmem:[#allocation12_spill] sm:$0xff]  ;;  %v6924_v21 = vsub.f32 %v2059_v43, %v6896_v45  ;;  %v6941_v14 = vand.u32 4294901760, %v6909_v42  ;;  %v2877_v58 = vand.u32 4294901760, %v2876_v1  ;;  %v7831_v43 = vld [vmem:[#allocation29_spill] sm:$0xff]  ;;  %v7047_v1 = vand.u32 4294901760, %v7017_v12 }
 0x1cf   : > { %5333 = vmatprep.subr.mxu1 %v6638_v20  ;;  %5291 = vmatpush3.msra.mxu0 %v7823_v7  ;;  %v7037_v7 = vand.u32 4294901760, %v2051_v61 }
 0x1d0   : > { %5334 = vmatpush3.msra.mxu1 %v6638_v20  ;;  %5292 = vmatprep.subr.mxu0 %v7824_v28  ;;  %v6921_v20 = vand.u32 4294901760, %v6894_v25  ;;  %v6955_v55 = vand.u32 4294901760, %v6924_v21  ;;  %v2890_v13 = vsub.f32 %v6909_v42, %v6941_v14 }
 0x1d1   : > { %5335 = vmatprep.subr.mxu1 %v6654_v57  ;;  %5293 = vmatpush3.msra.mxu0 %v7824_v28  ;;  %v2918_v28 = vsub.f32 %v6979_v30, %v7009_v19 }
 0x1d2   : > { %5336 = vmatpush3.msra.mxu1 %v6654_v57  ;;  %5294 = vmatprep.subr.mxu0 %v7825_v2  ;;  %v2055_v57 = vld [vmem:[%s7720_s3 + $0x40] sm:$0xff]  ;;  %v2883_v38 = vsub.f32 %v6894_v25, %v6921_v20  ;;  %v2891_v17 = vand.u32 4294901760, %v2890_v13  ;;  %v7065_v13 = vsub.f32 %v2051_v61, %v7037_v7 }
 0x1d3   : > { %5337 = vmatprep.subr.mxu1 %v7806_v63  ;;  %5295 = vmatpush3.msra.mxu0 %v7825_v2  ;;  %v6960_v54 = vand.u32 4294901760, %v2055_v57  ;;  %v7832_v2 = vld [vmem:[#allocation31_spill] sm:$0xff] }
 0x1d4   : > { %5338 = vmatpush3.msra.mxu1 %v7806_v63  ;;  %5296 = vmatprep.subr.mxu0 %v7826_v34  ;;  %v7829_v63 = vld [vmem:[#allocation23_spill] sm:$0xff]  ;;  %v2884_v6 = vand.u32 4294901760, %v2883_v38 }
 0x1d5   : > { %5339 = vmatprep.subr.mxu1 %v7808_v22  ;;  %5297 = vmatpush3.msra.mxu0 %v7826_v34  ;;  %v7052_v34 = vand.u32 4294901760, %v2050_v5 }
 0x1d6   : > { %5340 = vmatpush3.msra.mxu1 %v7808_v22  ;;  %5298 = vmatprep.subr.mxu0 %v7827_v62  ;;  %v2897_v22 = vsub.f32 %v6924_v21, %v6955_v55 }
 0x1d7   : > { %5341 = vmatprep.subr.mxu1 %v7810_v33  ;;  %5299 = vmatpush3.msra.mxu0 %v7827_v62  ;;  %v2912_v62 = vand.u32 4294901760, %v2911_v8 }
 0x1d8   : > { %5342 = vmatpush3.msra.mxu1 %v7810_v33  ;;  %5300 = vmatprep.subr.mxu0 %v7828_v16  ;;  %v6996_v33 = vsub.f32 %v2055_v57, %v6960_v54  ;;  %v2898_v18 = vand.u32 4294901760, %v2897_v22  ;;  %v7050_v57 = vsub.f32 %v2052_v35, %v7019_v24  ;;  %v7080_v35 = vsub.f32 %v2050_v5, %v7052_v34 }
 0x1d9   : > { %5343 = vmatprep.subr.mxu1 %v7812_v44  ;;  %5301 = vmatpush3.msra.mxu0 %v7828_v16  ;;  %v7062_v16 = vand.u32 4294901760, %v7035_v46 }
 0x1da   : > { %5344 = vmatpush3.msra.mxu1 %v7812_v44  ;;  %5302 = vmatprep.subr.mxu0 %v7829_v63  ;;  %v2854_v44 = vand.u32 4294901760, %v6969_v60  ;;  %v7025_v32 = vand.u32 4294901760, %v6996_v33  ;;  %v7077_v22 = vand.u32 4294901760, %v7050_v57 }
 0x1db   : > { %5346 = vmatmul.mubr.f32.vlgmr.msra.gmra.mxu1 %v6746_v51  ;;  %5383 = vmatprep.subr.mxu1 %v2877_v58  ;;  %v2939_v61 = vsub.f32 %v7035_v46, %v7062_v16 }
 0x1dc   : > { %5303 = vmatpush3.msra.mxu0 %v7829_v63  ;;  %5384 = vmatpush3.msra.mxu1 %v2877_v58  ;;  %v2855_v36 = vsub.f32 %v6969_v60, %v2854_v44  ;;  %v2925_v38 = vsub.f32 %v6996_v33, %v7025_v32  ;;  %v2919_v63 = vand.u32 4294901760, %v2918_v28 }
 0x1dd   : > { %5415 = vmatprep.mubr.f32.mxu1 %v6933_v15  ;;  %5304 = vmatprep.subr.mxu0 %v7830_v0  ;;  %v2940_v28 = vand.u32 4294901760, %v2939_v61 }
 0x1de   : > { %5385 = vmatprep.subr.mxu1 %v2884_v6  ;;  %5305 = vmatpush3.msra.mxu0 %v7830_v0  ;;  %v2856_v58 = vand.u32 4294901760, %v2855_v36  ;;  %v2926_v37 = vand.u32 4294901760, %v2925_v38  ;;  %v7089_v0 = vand.u32 4294901760, %v7065_v13  ;;  %v7101_v36 = vand.u32 4294901760, %v7080_v35 }
 0x1df   : > { %5386 = vmatpush3.msra.mxu1 %v2884_v6  ;;  %5306 = vmatprep.subr.mxu0 %v7831_v43  ;;  %v2047_v6 = vld [vmem:[%s7720_s3] sm:$0xff] }
 0x1e0   : > { %5387 = vmatprep.subr.mxu1 %v2891_v17  ;;  %5307 = vmatpush3.msra.mxu0 %v7831_v43  ;;  %v7094_v8 = vand.u32 4294901760, %v2047_v6  ;;  %v2946_v43 = vsub.f32 %v7050_v57, %v7077_v22 }
 0x1e1   : > { %5388 = vmatpush3.msra.mxu1 %v2891_v17  ;;  %5308 = vmatprep.subr.mxu0 %v7832_v2  ;;  %v7082_v17 = vand.u32 4294901760, %v2048_v53 }
 0x1e2   : > { %5389 = vmatprep.subr.mxu1 %v2898_v18  ;;  %5309 = vmatpush3.msra.mxu0 %v7832_v2  ;;  %v2947_v38 = vand.u32 4294901760, %v2946_v43 }
 0x1e3   : > { %5390 = vmatpush3.msra.mxu1 %v2898_v18  ;;  %5311 = vmatmul.mubr.f32.vlgmr.msra.gmra.mxu0 %v6746_v51  ;;  %v2932_v51 = vsub.f32 %v7017_v12, %v7047_v1  ;;  %v7092_v18 = vsub.f32 %v2049_v56, %v7067_v23  ;;  %v2953_v56 = vsub.f32 %v7065_v13, %v7089_v0 }
 0x1e4   : > { %5348 = vmatprep.subr.mxu0 %v6858_v9  ;;  %5391 = vmatprep.subr.mxu1 %v2905_v47 }
 0x1e5   : > { %5349 = vmatpush3.msra.mxu0 %v6858_v9  ;;  %5380 = vmatprep.mubr.f32.mxu0 %v2856_v58  ;;  %v2933_v5 = vand.u32 4294901760, %v2932_v51  ;;  %v7111_v2 = vand.u32 4294901760, %v7092_v18 }
 0x1e6   : > { %5392 = vmatpush3.msra.mxu1 %v2905_v47  ;;  %5350 = vmatprep.subr.mxu0 %v6872_v27  ;;  %v7104_v47 = vsub.f32 %v2048_v53, %v7082_v17  ;;  %v2960_v53 = vsub.f32 %v7080_v35, %v7101_v36 }
 0x1e7   : > { %5393 = vmatprep.subr.mxu1 %v2912_v62  ;;  %5351 = vmatpush3.msra.mxu0 %v6872_v27 }
 0x1e8   : > { %5394 = vmatpush3.msra.mxu1 %v2912_v62  ;;  %5352 = vmatprep.subr.mxu0 %v6884_v41  ;;  %v7114_v62 = vsub.f32 %v2047_v6, %v7094_v8  ;;  %v7121_v58 = vand.u32 4294901760, %v7104_v47  ;;  %v2967_v6 = vsub.f32 %v7092_v18, %v7111_v2 }
 0x1e9   : > { %5395 = vmatprep.subr.mxu1 %v2919_v63  ;;  %5353 = vmatpush3.msra.mxu0 %v6884_v41 }
 0x1ea   : > { %5396 = vmatpush3.msra.mxu1 %v2919_v63  ;;  %5354 = vmatprep.subr.mxu0 %v6896_v45  ;;  %v2954_v63 = vand.u32 4294901760, %v2953_v56  ;;  %v7128_v51 = vand.u32 4294901760, %v7114_v62  ;;  %v2974_v61 = vsub.f32 %v7104_v47, %v7121_v58 }
 0x1eb   : > { %5397 = vmatprep.subr.mxu1 %v2926_v37  ;;  %5355 = vmatpush3.msra.mxu0 %v6896_v45 }
 0x1ec   : > { %5398 = vmatpush3.msra.mxu1 %v2926_v37  ;;  %5356 = vmatprep.subr.mxu0 %v6911_v10  ;;  %v2961_v37 = vand.u32 4294901760, %v2960_v53  ;;  %v2981_v43 = vsub.f32 %v7114_v62, %v7128_v51  ;;  %v2975_v56 = vand.u32 4294901760, %v2974_v61 }
 0x1ed   : > { %5399 = vmatprep.subr.mxu1 %v2933_v5  ;;  %5357 = vmatpush3.msra.mxu0 %v6911_v10 }
 0x1ee   : > { %5400 = vmatpush3.msra.mxu1 %v2933_v5  ;;  %5358 = vmatprep.subr.mxu0 %v6926_v49  ;;  %v2968_v5 = vand.u32 4294901760, %v2967_v6  ;;  %v4277_v6 = vld [vmem:[%s7720_s3 + $0x120] sm:$0xff] }
 0x1ef   : > { %5401 = vmatprep.subr.mxu1 %v2940_v28  ;;  %5359 = vmatpush3.msra.mxu0 %v6926_v49 }
 0x1f0   : > { %5402 = vmatpush3.msra.mxu1 %v2940_v28  ;;  %5360 = vmatprep.subr.mxu0 %v6946_v29  ;;  %v7139_v28 = vand.u32 4294901760, %v6740_v31 }
 0x1f1   : > { %5403 = vmatprep.subr.mxu1 %v2947_v38  ;;  %5361 = vmatpush3.msra.mxu0 %v6946_v29 }
 0x1f2   : > { %5404 = vmatpush3.msra.mxu1 %v2947_v38  ;;  %5362 = vmatprep.subr.mxu0 %v6960_v54  ;;  %v2982_v38 = vand.u32 4294901760, %v2981_v43  ;;  %v7147_v53 = vsub.f32 %v6740_v31, %v7139_v28 }
 0x1f3   : > { %5405 = vmatprep.subr.mxu1 %v2954_v63  ;;  %5363 = vmatpush3.msra.mxu0 %v6960_v54 }
 0x1f4   : > { %5406 = vmatpush3.msra.mxu1 %v2954_v63  ;;  %5364 = vmatprep.subr.mxu0 %v6986_v26  ;;  %v2864_v63 = vand.u32 4294901760, %v7147_v53 }
 0x1f5   : > { %5407 = vmatprep.subr.mxu1 %v2961_v37  ;;  %5365 = vmatpush3.msra.mxu0 %v6986_v26 }
 0x1f6   : > { %5408 = vmatpush3.msra.mxu1 %v2961_v37  ;;  %5366 = vmatprep.subr.mxu0 %v7003_v11  ;;  %v2865_v31 = vsub.f32 %v7147_v53, %v2864_v63 }
 0x1f7   : > { %5409 = vmatprep.subr.mxu1 %v2968_v5  ;;  %5367 = vmatpush3.msra.mxu0 %v7003_v11 }
 0x1f8   : > { %5410 = vmatpush3.msra.mxu1 %v2968_v5  ;;  %5368 = vmatprep.subr.mxu0 %v7019_v24 }
 0x1f9   : > { %5411 = vmatprep.subr.mxu1 %v2975_v56  ;;  %5369 = vmatpush3.msra.mxu0 %v7019_v24 }
 0x1fa   : > { %5412 = vmatpush3.msra.mxu1 %v2975_v56  ;;  %5370 = vmatprep.subr.mxu0 %v7037_v7  ;;  %v4276_v56 = vld [vmem:[%s7720_s3 + $0x118] sm:$0xff] }
 0x1fb   : > { %5413 = vmatprep.subr.mxu1 %v2982_v38  ;;  %5371 = vmatpush3.msra.mxu0 %v7037_v7 }
 0x1fc   : > { %5414 = vmatpush3.msra.mxu1 %v2982_v38  ;;  %5372 = vmatprep.subr.mxu0 %v7052_v34 }
 0x1fd   : > { %5416 = vmatmul.mubr.f32.vlgmr.msra.gmra.mxu1 %v7139_v28  ;;  %5453 = vmatprep.subr.mxu1 %v6858_v9 }
 0x1fe   : > { %5373 = vmatpush3.msra.mxu0 %v7052_v34  ;;  %5454 = vmatpush3.msra.mxu1 %v6858_v9 }
 0x1ff   : > { %5485 = vmatprep.mubr.f32.mxu1 %v2854_v44  ;;  %5374 = vmatprep.subr.mxu0 %v7067_v23  ;;  %v2866_v44 = vand.u32 4294901760, %v2865_v31 }
 0x200   : > { %5455 = vmatprep.subr.mxu1 %v6872_v27  ;;  %5375 = vmatpush3.msra.mxu0 %v7067_v23 }
 0x201   : > { %5456 = vmatpush3.msra.mxu1 %v6872_v27  ;;  %5376 = vmatprep.subr.mxu0 %v7082_v17 }
 0x202   : > { %5457 = vmatprep.subr.mxu1 %v6884_v41  ;;  %5377 = vmatpush3.msra.mxu0 %v7082_v17 }
 0x203   : > { %5458 = vmatpush3.msra.mxu1 %v6884_v41  ;;  %5378 = vmatprep.subr.mxu0 %v7094_v8 }
 0x204   : > { %5459 = vmatprep.subr.mxu1 %v6896_v45  ;;  %5379 = vmatpush3.msra.mxu0 %v7094_v8 }
 0x205   : > { %5460 = vmatpush3.msra.mxu1 %v6896_v45  ;;  %5381 = vmatmul.mubr.f32.vlgmr.msra.gmra.mxu0 %v2866_v44  ;;  %v4275_v44 = vld [vmem:[%s7720_s3 + $0x110] sm:$0xff] }
 0x206   : > { %5418 = vmatprep.subr.mxu0 %v6877_v40  ;;  %5461 = vmatprep.subr.mxu1 %v6911_v10 }
 0x207   : > { %5419 = vmatpush3.msra.mxu0 %v6877_v40  ;;  %5450 = vmatprep.mubr.f32.mxu0 %v6969_v60  ;;  %v4287_v40 = vld [vmem:[%s7720_s3 + $0x170] sm:$0xff] }
 0x208   : > { %5462 = vmatpush3.msra.mxu1 %v6911_v10  ;;  %5420 = vmatprep.subr.mxu0 %v6894_v25 }
 0x209   : > { %5463 = vmatprep.subr.mxu1 %v6926_v49  ;;  %5421 = vmatpush3.msra.mxu0 %v6894_v25  ;;  %v7274_v25 = vand.u32 4294901760, %v4287_v40 }
 0x20a   : > { %5464 = vmatpush3.msra.mxu1 %v6926_v49  ;;  %5422 = vmatprep.subr.mxu0 %v6909_v42 }
 0x20b   : > { %5465 = vmatprep.subr.mxu1 %v6946_v29  ;;  %5423 = vmatpush3.msra.mxu0 %v6909_v42 }
 0x20c   : > { %5466 = vmatpush3.msra.mxu1 %v6946_v29  ;;  %5424 = vmatprep.subr.mxu0 %v6924_v21 }
 0x20d   : > { %5467 = vmatprep.subr.mxu1 %v6960_v54  ;;  %5425 = vmatpush3.msra.mxu0 %v6924_v21 }
 0x20e   : > { %5468 = vmatpush3.msra.mxu1 %v6960_v54  ;;  %5426 = vmatprep.subr.mxu0 %v6944_v52 }
 0x20f   : > { %5469 = vmatprep.subr.mxu1 %v6986_v26  ;;  %5427 = vmatpush3.msra.mxu0 %v6944_v52  ;;  %v4283_v52 = vld [vmem:[%s7720_s3 + $0x150] sm:$0xff] }
 0x210   : > { %5470 = vmatpush3.msra.mxu1 %v6986_v26  ;;  %5428 = vmatprep.subr.mxu0 %v6958_v39 }
 0x211   : > { %5471 = vmatprep.subr.mxu1 %v7003_v11  ;;  %5429 = vmatpush3.msra.mxu0 %v6958_v39 }
 0x212   : > { %5472 = vmatpush3.msra.mxu1 %v7003_v11  ;;  %5430 = vmatprep.subr.mxu0 %v6979_v30 }
 0x213   : > { %5473 = vmatprep.subr.mxu1 %v7019_v24  ;;  %5431 = vmatpush3.msra.mxu0 %v6979_v30  ;;  %v4281_v30 = vld [vmem:[%s7720_s3 + $0x140] sm:$0xff] }
 0x214   : > { %5474 = vmatpush3.msra.mxu1 %v7019_v24  ;;  %5432 = vmatprep.subr.mxu0 %v6996_v33 }
 0x215   : > { %5475 = vmatprep.subr.mxu1 %v7037_v7  ;;  %5433 = vmatpush3.msra.mxu0 %v6996_v33 }
 0x216   : > { %5476 = vmatpush3.msra.mxu1 %v7037_v7  ;;  %5434 = vmatprep.subr.mxu0 %v7017_v12 }
 0x217   : > { %5477 = vmatprep.subr.mxu1 %v7052_v34  ;;  %5435 = vmatpush3.msra.mxu0 %v7017_v12 }
 0x218   : > { %5478 = vmatpush3.msra.mxu1 %v7052_v34  ;;  %5436 = vmatprep.subr.mxu0 %v7035_v46 }
 0x219   : > { %5479 = vmatprep.subr.mxu1 %v7067_v23  ;;  %5437 = vmatpush3.msra.mxu0 %v7035_v46 }
 0x21a   : > { %5480 = vmatpush3.msra.mxu1 %v7067_v23  ;;  %5438 = vmatprep.subr.mxu0 %v7050_v57 }
 0x21b   : > { %5481 = vmatprep.subr.mxu1 %v7082_v17  ;;  %5439 = vmatpush3.msra.mxu0 %v7050_v57 }
 0x21c   : > { %5482 = vmatpush3.msra.mxu1 %v7082_v17  ;;  %5440 = vmatprep.subr.mxu0 %v7065_v13 }
 0x21d   : > { %5483 = vmatprep.subr.mxu1 %v7094_v8  ;;  %5441 = vmatpush3.msra.mxu0 %v7065_v13 }
 0x21e   : > { %5484 = vmatpush3.msra.mxu1 %v7094_v8  ;;  %5442 = vmatprep.subr.mxu0 %v7080_v35 }
 0x21f   : > { %5486 = vmatmul.mubr.f32.vlgmr.msra.gmra.mxu1 %v2864_v63  ;;  %5523 = vmatprep.subr.mxu1 %v6858_v9 }
 0x220   : > { %5443 = vmatpush3.msra.mxu0 %v7080_v35  ;;  %5524 = vmatpush3.msra.mxu1 %v6858_v9  ;;  %v4288_v9 = vld [vmem:[%s7720_s3 + $0x178] sm:$0xff] }
 0x221   : > { %5555 = vmatprep.mubr.f32.mxu1 %v6933_v15  ;;  %5444 = vmatprep.subr.mxu0 %v7092_v18 }
 0x222   : > { %5525 = vmatprep.subr.mxu1 %v6872_v27  ;;  %5445 = vmatpush3.msra.mxu0 %v7092_v18 }
 0x223   : > { %5526 = vmatpush3.msra.mxu1 %v6872_v27  ;;  %5446 = vmatprep.subr.mxu0 %v7104_v47  ;;  %v7260_v27 = vand.u32 4294901760, %v4288_v9 }
 0x224   : > { %5527 = vmatprep.subr.mxu1 %v6884_v41  ;;  %5447 = vmatpush3.msra.mxu0 %v7104_v47 }
 0x225   : > { %5528 = vmatpush3.msra.mxu1 %v6884_v41  ;;  %5448 = vmatprep.subr.mxu0 %v7114_v62  ;;  %v4286_v41 = vld [vmem:[%s7720_s3 + $0x168] sm:$0xff] }
 0x226   : > { %5529 = vmatprep.subr.mxu1 %v6896_v45  ;;  %5449 = vmatpush3.msra.mxu0 %v7114_v62  ;;  %v7286_v42 = vand.u32 4294901760, %v4286_v41 }
 0x227   : > { %5530 = vmatpush3.msra.mxu1 %v6896_v45  ;;  %5451 = vmatmul.mubr.f32.vlgmr.msra.gmra.mxu0 %v7147_v53  ;;  %v7279_v45 = vsub.f32 %v4288_v9, %v7260_v27  ;;  %v7439_v53 = vand.u32 4294901760, %v4277_v6 }
 0x228   : > { %5488 = vmatprep.subr.mxu0 %v6901_v48  ;;  %5531 = vmatprep.subr.mxu1 %v6911_v10 }
 0x229   : > { %5489 = vmatpush3.msra.mxu0 %v6901_v48  ;;  %5520 = vmatprep.mubr.f32.mxu0 %v6933_v15  ;;  %v4285_v48 = vld [vmem:[%s7720_s3 + $0x160] sm:$0xff]  ;;  %v7308_v15 = vsub.f32 %v4286_v41, %v7286_v42  ;;  %v7454_v41 = vand.u32 4294901760, %v4276_v56 }
 0x22a   : > { %5532 = vmatpush3.msra.mxu1 %v6911_v10  ;;  %5490 = vmatprep.subr.mxu0 %v6921_v20  ;;  %v4284_v10 = vld [vmem:[%s7720_s3 + $0x158] sm:$0xff]  ;;  %v7298_v21 = vand.u32 4294901760, %v4285_v48 }
 0x22b   : > { %5533 = vmatprep.subr.mxu1 %v6926_v49  ;;  %5491 = vmatpush3.msra.mxu0 %v6921_v20  ;;  %v7296_v20 = vsub.f32 %v4287_v40, %v7274_v25 }
 0x22c   : > { %5534 = vmatpush3.msra.mxu1 %v6926_v49  ;;  %5492 = vmatprep.subr.mxu0 %v6941_v14  ;;  %v7303_v49 = vand.u32 4294901760, %v7279_v45 }
 0x22d   : > { %5535 = vmatprep.subr.mxu1 %v6946_v29  ;;  %5493 = vmatpush3.msra.mxu0 %v6941_v14  ;;  %v7310_v14 = vand.u32 4294901760, %v4284_v10  ;;  %v7326_v39 = vand.u32 4294901760, %v7296_v20 }
 0x22e   : > { %5536 = vmatpush3.msra.mxu1 %v6946_v29  ;;  %5494 = vmatprep.subr.mxu0 %v6955_v55  ;;  %v4282_v29 = vld [vmem:[%s7720_s3 + $0x148] sm:$0xff]  ;;  %v3582_v60 = vsub.f32 %v7279_v45, %v7303_v49 }
 0x22f   : > { %5537 = vmatprep.subr.mxu1 %v6960_v54  ;;  %5495 = vmatpush3.msra.mxu0 %v6955_v55  ;;  %v7323_v55 = vand.u32 4294901760, %v6760_v59  ;;  %v7348_v33 = vand.u32 4294901760, %v4282_v29 }
 0x230   : > { %5538 = vmatpush3.msra.mxu1 %v6960_v54  ;;  %5496 = vmatprep.subr.mxu0 %v6976_v3  ;;  %v7329_v54 = vsub.f32 %v4285_v48, %v7298_v21  ;;  %v3583_v46 = vand.u32 4294901760, %v3582_v60  ;;  %v7467_v60 = vsub.f32 %v4277_v6, %v7439_v53 }
 0x231   : > { %5539 = vmatprep.subr.mxu1 %v6986_v26  ;;  %5497 = vmatpush3.msra.mxu0 %v6976_v3  ;;  %v7335_v3 = vand.u32 4294901760, %v4283_v52  ;;  %v7361_v12 = vsub.f32 %v6760_v59, %v7323_v55  ;;  %v7381_v57 = vsub.f32 %v4282_v29, %v7348_v33 }
 0x232   : > { %5540 = vmatpush3.msra.mxu1 %v6986_v26  ;;  %5498 = vmatprep.subr.mxu0 %v6993_v4  ;;  %v7343_v26 = vand.u32 4294901760, %v7308_v15 }
 0x233   : > { %5541 = vmatprep.subr.mxu1 %v7003_v11  ;;  %5499 = vmatpush3.msra.mxu0 %v6993_v4  ;;  %v7346_v4 = vsub.f32 %v4284_v10, %v7310_v14  ;;  %v7411_v62 = vand.u32 4294901760, %v7381_v57  ;;  %v4274_v10 = vld [vmem:[%s7720_s3 + $0x108] sm:$0xff] }
 0x234   : > { %5542 = vmatpush3.msra.mxu1 %v7003_v11  ;;  %5500 = vmatprep.subr.mxu0 %v7009_v19  ;;  %v3589_v11 = vsub.f32 %v7296_v20, %v7326_v39  ;;  %v3596_v59 = vsub.f32 %v7308_v15, %v7343_v26 }
 0x235   : > { %5543 = vmatprep.subr.mxu1 %v7019_v24  ;;  %5501 = vmatpush3.msra.mxu0 %v7009_v19  ;;  %v7357_v19 = vand.u32 4294901760, %v7329_v54  ;;  %v3624_v31 = vsub.f32 %v7381_v57, %v7411_v62 }
 0x236   : > { %5544 = vmatpush3.msra.mxu1 %v7019_v24  ;;  %5502 = vmatprep.subr.mxu0 %v7025_v32  ;;  %v7363_v24 = vand.u32 4294901760, %v4281_v30  ;;  %v3590_v13 = vand.u32 4294901760, %v3589_v11  ;;  %v4273_v11 = vld [vmem:[%s7720_s3 + $0x100] sm:$0xff] }
 0x237   : > { %5545 = vmatprep.subr.mxu1 %v7037_v7  ;;  %5503 = vmatpush3.msra.mxu0 %v7025_v32  ;;  %v4280_v32 = vld [vmem:[%s7720_s3 + $0x138] sm:$0xff] }
 0x238   : > { %5546 = vmatpush3.msra.mxu1 %v7037_v7  ;;  %5504 = vmatprep.subr.mxu0 %v7047_v1  ;;  %v7371_v7 = vsub.f32 %v4283_v52, %v7335_v3  ;;  %v7396_v35 = vsub.f32 %v4281_v30, %v7363_v24  ;;  %v7469_v30 = vand.u32 4294901760, %v4275_v44 }
 0x239   : > { %5547 = vmatprep.subr.mxu1 %v7052_v34  ;;  %5505 = vmatpush3.msra.mxu0 %v7047_v1  ;;  %v7378_v1 = vand.u32 4294901760, %v7346_v4 }
 0x23a   : > { %5548 = vmatpush3.msra.mxu1 %v7052_v34  ;;  %5506 = vmatprep.subr.mxu0 %v7062_v16  ;;  %v4279_v34 = vld [vmem:[%s7720_s3 + $0x130] sm:$0xff]  ;;  %v7428_v43 = vand.u32 4294901760, %v7396_v35 }
 0x23b   : > { %5549 = vmatprep.subr.mxu1 %v7067_v23  ;;  %5507 = vmatpush3.msra.mxu0 %v7062_v16  ;;  %v7388_v16 = vand.u32 4294901760, %v4280_v32  ;;  %v7405_v18 = vand.u32 4294901760, %v4279_v34  ;;  %v3610_v47 = vsub.f32 %v7346_v4, %v7378_v1 }
 0x23c   : > { %5550 = vmatpush3.msra.mxu1 %v7067_v23  ;;  %5508 = vmatprep.subr.mxu0 %v7077_v22  ;;  %v3603_v23 = vsub.f32 %v7329_v54, %v7357_v19  ;;  %v3631_v48 = vsub.f32 %v7396_v35, %v7428_v43 }
 0x23d   : > { %5551 = vmatprep.subr.mxu1 %v7082_v17  ;;  %5509 = vmatpush3.msra.mxu0 %v7077_v22  ;;  %v3560_v22 = vand.u32 4294901760, %v7361_v12  ;;  %v7419_v37 = vsub.f32 %v4280_v32, %v7388_v16  ;;  %v3611_v63 = vand.u32 4294901760, %v3610_v47 }
 0x23e   : > { %5552 = vmatpush3.msra.mxu1 %v7082_v17  ;;  %5510 = vmatprep.subr.mxu0 %v7089_v0  ;;  %v4278_v17 = vld [vmem:[%s7720_s3 + $0x128] sm:$0xff]  ;;  %v3604_v61 = vand.u32 4294901760, %v3603_v23  ;;  %v7491_v23 = vand.u32 4294901760, %v7467_v60 }
 0x23f   : > { %5553 = vmatprep.subr.mxu1 %v7094_v8  ;;  %5511 = vmatpush3.msra.mxu0 %v7089_v0  ;;  %v7403_v0 = vand.u32 4294901760, %v7371_v7  ;;  %v3561_v5 = vsub.f32 %v7361_v12, %v3560_v22  ;;  %v7449_v9 = vand.u32 4294901760, %v7419_v37 }
 0x240   : > { %5554 = vmatpush3.msra.mxu1 %v7094_v8  ;;  %5512 = vmatprep.subr.mxu0 %v7101_v36  ;;  %v3597_v8 = vand.u32 4294901760, %v3596_v59  ;;  %v7484_v59 = vand.u32 4294901760, %v4274_v10 }
 0x241   : > { %5556 = vmatmul.mubr.f32.vlgmr.msra.gmra.mxu1 %v7139_v28  ;;  %5593 = vmatprep.subr.mxu1 %v3583_v46  ;;  %v3617_v38 = vsub.f32 %v7371_v7, %v7403_v0 }
 0x242   : > { %5513 = vmatpush3.msra.mxu0 %v7101_v36  ;;  %5594 = vmatpush3.msra.mxu1 %v3583_v46  ;;  %v7421_v36 = vand.u32 4294901760, %v4278_v17  ;;  %v7482_v46 = vsub.f32 %v4276_v56, %v7454_v41 }
 0x243   : > { %5625 = vmatprep.mubr.f32.mxu1 %v7323_v55  ;;  %5514 = vmatprep.subr.mxu0 %v7111_v2  ;;  %v3618_v52 = vand.u32 4294901760, %v3617_v38  ;;  %v3659_v38 = vsub.f32 %v7467_v60, %v7491_v23 }
 0x244   : > { %5595 = vmatprep.subr.mxu1 %v3590_v13  ;;  %5515 = vmatpush3.msra.mxu0 %v7111_v2  ;;  %v7437_v2 = vsub.f32 %v4279_v34, %v7405_v18  ;;  %v7452_v40 = vsub.f32 %v4278_v17, %v7421_v36  ;;  %v3632_v34 = vand.u32 4294901760, %v3631_v48  ;;  %v7494_v17 = vsub.f32 %v4275_v44, %v7469_v30 }
 0x245   : > { %5596 = vmatpush3.msra.mxu1 %v3590_v13  ;;  %5516 = vmatprep.subr.mxu0 %v7121_v58 }
 0x246   : > { %5597 = vmatprep.subr.mxu1 %v3597_v8  ;;  %5517 = vmatpush3.msra.mxu0 %v7121_v58  ;;  %v3562_v58 = vand.u32 4294901760, %v3561_v5  ;;  %v7464_v29 = vand.u32 4294901760, %v7437_v2  ;;  %v7479_v32 = vand.u32 4294901760, %v7452_v40  ;;  %v7506_v5 = vsub.f32 %v4274_v10, %v7484_v59 }
 0x247   : > { %5598 = vmatpush3.msra.mxu1 %v3597_v8  ;;  %5518 = vmatprep.subr.mxu0 %v7128_v51  ;;  %v7496_v8 = vand.u32 4294901760, %v4273_v11  ;;  %v3660_v10 = vand.u32 4294901760, %v3659_v38 }
 0x248   : > { %5599 = vmatprep.subr.mxu1 %v3604_v61  ;;  %5519 = vmatpush3.msra.mxu0 %v7128_v51  ;;  %v3625_v51 = vand.u32 4294901760, %v3624_v31  ;;  %v3645_v13 = vsub.f32 %v7437_v2, %v7464_v29  ;;  %v3652_v6 = vsub.f32 %v7452_v40, %v7479_v32  ;;  %v7523_v48 = vand.u32 4294901760, %v7506_v5 }
 0x249   : > { %5600 = vmatpush3.msra.mxu1 %v3604_v61  ;;  %5521 = vmatmul.mubr.f32.vlgmr.msra.gmra.mxu0 %v7139_v28  ;;  %v3638_v28 = vsub.f32 %v7419_v37, %v7449_v9  ;;  %v7503_v61 = vand.u32 4294901760, %v7482_v46  ;;  %v7516_v31 = vsub.f32 %v4273_v11, %v7496_v8 }
 0x24a   : > { %5558 = vmatprep.subr.mxu0 %v7260_v27  ;;  %5601 = vmatprep.subr.mxu1 %v3611_v63  ;;  %v3646_v56 = vand.u32 4294901760, %v3645_v13  ;;  %v3653_v44 = vand.u32 4294901760, %v3652_v6 }
 0x24b   : > { %5559 = vmatpush3.msra.mxu0 %v7260_v27  ;;  %5590 = vmatprep.mubr.f32.mxu0 %v3562_v58  ;;  %v3639_v47 = vand.u32 4294901760, %v3638_v28  ;;  %v3666_v58 = vsub.f32 %v7482_v46, %v7503_v61  ;;  %v3680_v28 = vsub.f32 %v7506_v5, %v7523_v48 }
 0x24c   : > { %5602 = vmatpush3.msra.mxu1 %v3611_v63  ;;  %5560 = vmatprep.subr.mxu0 %v7274_v25  ;;  %v7513_v63 = vand.u32 4294901760, %v7494_v17 }
 0x24d   : > { %5603 = vmatprep.subr.mxu1 %v3618_v52  ;;  %5561 = vmatpush3.msra.mxu0 %v7274_v25  ;;  %v3667_v11 = vand.u32 4294901760, %v3666_v58  ;;  %v3681_v6 = vand.u32 4294901760, %v3680_v28 }
 0x24e   : > { %5604 = vmatpush3.msra.mxu1 %v3618_v52  ;;  %5562 = vmatprep.subr.mxu0 %v7286_v42  ;;  %v3673_v52 = vsub.f32 %v7494_v17, %v7513_v63 }
 0x24f   : > { %5605 = vmatprep.subr.mxu1 %v3625_v51  ;;  %5563 = vmatpush3.msra.mxu0 %v7286_v42 }
 0x250   : > { %5606 = vmatpush3.msra.mxu1 %v3625_v51  ;;  %5564 = vmatprep.subr.mxu0 %v7298_v21  ;;  %v7530_v51 = vand.u32 4294901760, %v7516_v31 }
 0x251   : > { %5607 = vmatprep.subr.mxu1 %v3632_v34  ;;  %5565 = vmatpush3.msra.mxu0 %v7298_v21 }
 0x252   : > { %5608 = vmatpush3.msra.mxu1 %v3632_v34  ;;  %5566 = vmatprep.subr.mxu0 %v7310_v14  ;;  %v3674_v34 = vand.u32 4294901760, %v3673_v52  ;;  %v3687_v13 = vsub.f32 %v7516_v31, %v7530_v51 }
 0x253   : > { %5609 = vmatprep.subr.mxu1 %v3639_v47  ;;  %5567 = vmatpush3.msra.mxu0 %v7310_v14 }
 0x254   : > { %5610 = vmatpush3.msra.mxu1 %v3639_v47  ;;  %5568 = vmatprep.subr.mxu0 %v7335_v3  ;;  %v7541_v47 = vand.u32 4294901760, %v6750_v50 }
 0x255   : > { %5611 = vmatprep.subr.mxu1 %v3646_v56  ;;  %5569 = vmatpush3.msra.mxu0 %v7335_v3 }
 0x256   : > { %5612 = vmatpush3.msra.mxu1 %v3646_v56  ;;  %5570 = vmatprep.subr.mxu0 %v7348_v33  ;;  %v3688_v56 = vand.u32 4294901760, %v3687_v13  ;;  %v7549_v38 = vsub.f32 %v6750_v50, %v7541_v47 }
 0x257   : > { %5613 = vmatprep.subr.mxu1 %v3653_v44  ;;  %5571 = vmatpush3.msra.mxu0 %v7348_v33 }
 0x258   : > { %5614 = vmatpush3.msra.mxu1 %v3653_v44  ;;  %5572 = vmatprep.subr.mxu0 %v7363_v24  ;;  %v3570_v44 = vand.u32 4294901760, %v7549_v38 }
 0x259   : > { %5615 = vmatprep.subr.mxu1 %v3660_v10  ;;  %5573 = vmatpush3.msra.mxu0 %v7363_v24 }
 0x25a   : > { %5616 = vmatpush3.msra.mxu1 %v3660_v10  ;;  %5574 = vmatprep.subr.mxu0 %v7388_v16  ;;  %v3571_v50 = vsub.f32 %v7549_v38, %v3570_v44 }
 0x25b   : > { %5617 = vmatprep.subr.mxu1 %v3667_v11  ;;  %5575 = vmatpush3.msra.mxu0 %v7388_v16 }
 0x25c   : > { %5618 = vmatpush3.msra.mxu1 %v3667_v11  ;;  %5576 = vmatprep.subr.mxu0 %v7405_v18 }
 0x25d   : > { %5619 = vmatprep.subr.mxu1 %v3674_v34  ;;  %5577 = vmatpush3.msra.mxu0 %v7405_v18 }
 0x25e   : > { %5620 = vmatpush3.msra.mxu1 %v3674_v34  ;;  %5578 = vmatprep.subr.mxu0 %v7421_v36 }
 0x25f   : > { %5621 = vmatprep.subr.mxu1 %v3681_v6  ;;  %5579 = vmatpush3.msra.mxu0 %v7421_v36 }
 0x260   : > { %5622 = vmatpush3.msra.mxu1 %v3681_v6  ;;  %5580 = vmatprep.subr.mxu0 %v7439_v53 }
 0x261   : > { %5623 = vmatprep.subr.mxu1 %v3688_v56  ;;  %5581 = vmatpush3.msra.mxu0 %v7439_v53 }
 0x262   : > { %5624 = vmatpush3.msra.mxu1 %v3688_v56  ;;  %5582 = vmatprep.subr.mxu0 %v7454_v41 }
 0x263   : > { %5626 = vmatmul.mubr.f32.vlgmr.msra.gmra.mxu1 %v7541_v47  ;;  %5663 = vmatprep.subr.mxu1 %v7260_v27 }
 0x264   : > { %5583 = vmatpush3.msra.mxu0 %v7454_v41  ;;  %5664 = vmatpush3.msra.mxu1 %v7260_v27 }
 0x265   : > { %5695 = vmatprep.mubr.f32.mxu1 %v3560_v22  ;;  %5584 = vmatprep.subr.mxu0 %v7469_v30  ;;  %v3572_v22 = vand.u32 4294901760, %v3571_v50 }
 0x266   : > { %5665 = vmatprep.subr.mxu1 %v7274_v25  ;;  %5585 = vmatpush3.msra.mxu0 %v7469_v30 }
 0x267   : > { %5666 = vmatpush3.msra.mxu1 %v7274_v25  ;;  %5586 = vmatprep.subr.mxu0 %v7484_v59 }
 0x268   : > { %5667 = vmatprep.subr.mxu1 %v7286_v42  ;;  %5587 = vmatpush3.msra.mxu0 %v7484_v59 }
 0x269   : > { %5668 = vmatpush3.msra.mxu1 %v7286_v42  ;;  %5588 = vmatprep.subr.mxu0 %v7496_v8 }
 0x26a   : > { %5669 = vmatprep.subr.mxu1 %v7298_v21  ;;  %5589 = vmatpush3.msra.mxu0 %v7496_v8 }
 0x26b   : > { %5670 = vmatpush3.msra.mxu1 %v7298_v21  ;;  %5591 = vmatmul.mubr.f32.vlgmr.msra.gmra.mxu0 %v3572_v22 }
 0x26c   : > { %5628 = vmatprep.subr.mxu0 %v7279_v45  ;;  %5671 = vmatprep.subr.mxu1 %v7310_v14 }
 0x26d   : > { %5629 = vmatpush3.msra.mxu0 %v7279_v45  ;;  %5660 = vmatprep.mubr.f32.mxu0 %v7361_v12 }
 0x26e   : > { %5672 = vmatpush3.msra.mxu1 %v7310_v14  ;;  %5630 = vmatprep.subr.mxu0 %v7296_v20 }
 0x26f   : > { %5673 = vmatprep.subr.mxu1 %v7335_v3  ;;  %5631 = vmatpush3.msra.mxu0 %v7296_v20 }
 0x270   : > { %5674 = vmatpush3.msra.mxu1 %v7335_v3  ;;  %5632 = vmatprep.subr.mxu0 %v7308_v15 }
 0x271   : > { %5675 = vmatprep.subr.mxu1 %v7348_v33  ;;  %5633 = vmatpush3.msra.mxu0 %v7308_v15 }
 0x272   : > { %5676 = vmatpush3.msra.mxu1 %v7348_v33  ;;  %5634 = vmatprep.subr.mxu0 %v7329_v54 }
 0x273   : > { %5677 = vmatprep.subr.mxu1 %v7363_v24  ;;  %5635 = vmatpush3.msra.mxu0 %v7329_v54 }
 0x274   : > { %5678 = vmatpush3.msra.mxu1 %v7363_v24  ;;  %5636 = vmatprep.subr.mxu0 %v7346_v4 }
 0x275   : > { %5679 = vmatprep.subr.mxu1 %v7388_v16  ;;  %5637 = vmatpush3.msra.mxu0 %v7346_v4 }
 0x276   : > { %5680 = vmatpush3.msra.mxu1 %v7388_v16  ;;  %5638 = vmatprep.subr.mxu0 %v7371_v7 }
 0x277   : > { %5681 = vmatprep.subr.mxu1 %v7405_v18  ;;  %5639 = vmatpush3.msra.mxu0 %v7371_v7 }
 0x278   : > { %5682 = vmatpush3.msra.mxu1 %v7405_v18  ;;  %5640 = vmatprep.subr.mxu0 %v7381_v57 }
 0x279   : > { %5683 = vmatprep.subr.mxu1 %v7421_v36  ;;  %5641 = vmatpush3.msra.mxu0 %v7381_v57 }
 0x27a   : > { %5684 = vmatpush3.msra.mxu1 %v7421_v36  ;;  %5642 = vmatprep.subr.mxu0 %v7396_v35 }
 0x27b   : > { %5685 = vmatprep.subr.mxu1 %v7439_v53  ;;  %5643 = vmatpush3.msra.mxu0 %v7396_v35 }
 0x27c   : > { %5686 = vmatpush3.msra.mxu1 %v7439_v53  ;;  %5644 = vmatprep.subr.mxu0 %v7419_v37 }
 0x27d   : > { %5687 = vmatprep.subr.mxu1 %v7454_v41  ;;  %5645 = vmatpush3.msra.mxu0 %v7419_v37 }
 0x27e   : > { %5688 = vmatpush3.msra.mxu1 %v7454_v41  ;;  %5646 = vmatprep.subr.mxu0 %v7437_v2 }
 0x27f   : > { %5689 = vmatprep.subr.mxu1 %v7469_v30  ;;  %5647 = vmatpush3.msra.mxu0 %v7437_v2 }
 0x280   : > { %5690 = vmatpush3.msra.mxu1 %v7469_v30  ;;  %5648 = vmatprep.subr.mxu0 %v7452_v40 }
 0x281   : > { %5691 = vmatprep.subr.mxu1 %v7484_v59  ;;  %5649 = vmatpush3.msra.mxu0 %v7452_v40 }
 0x282   : > { %5692 = vmatpush3.msra.mxu1 %v7484_v59  ;;  %5650 = vmatprep.subr.mxu0 %v7467_v60 }
 0x283   : > { %5693 = vmatprep.subr.mxu1 %v7496_v8  ;;  %5651 = vmatpush3.msra.mxu0 %v7467_v60 }
 0x284   : > { %5694 = vmatpush3.msra.mxu1 %v7496_v8  ;;  %5652 = vmatprep.subr.mxu0 %v7482_v46 }
 0x285   : > { %5696 = vmatmul.mubr.f32.vlgmr.msra.gmra.mxu1 %v3570_v44  ;;  %5733 = vmatprep.subr.mxu1 %v7260_v27 }
 0x286   : > { %5653 = vmatpush3.msra.mxu0 %v7482_v46  ;;  %5734 = vmatpush3.msra.mxu1 %v7260_v27  ;;  %v5172_v27 = vpop.f32.mrf.mxu0 }
 0x287   : > { %5765 = vmatprep.mubr.f32.mxu1 %v7323_v55  ;;  %5654 = vmatprep.subr.mxu0 %v7494_v17 }
 0x288   : > { %5735 = vmatprep.subr.mxu1 %v7274_v25  ;;  %5655 = vmatpush3.msra.mxu0 %v7494_v17  ;;  %v2174_v45 = vpop.f32.mrf.mxu0 }
 0x289   : > { %5736 = vmatpush3.msra.mxu1 %v7274_v25  ;;  %5656 = vmatprep.subr.mxu0 %v7506_v5  ;;  %v5207_v25 = vpop.f32.mrf.mxu1 }
 0x28a   : > { %5737 = vmatprep.subr.mxu1 %v7286_v42  ;;  %5657 = vmatpush3.msra.mxu0 %v7506_v5 }
 0x28b   : > { %5738 = vmatpush3.msra.mxu1 %v7286_v42  ;;  %5658 = vmatprep.subr.mxu0 %v7516_v31  ;;  %v5242_v42 = vpop.f32.mrf.mxu0  ;;  %v2335_v20 = vpop.f32.mrf.mxu1 }
 0x28c   : > { %5739 = vmatprep.subr.mxu1 %v7298_v21  ;;  %5659 = vmatpush3.msra.mxu0 %v7516_v31 }
 0x28d   : > { %5740 = vmatpush3.msra.mxu1 %v7298_v21  ;;  %5661 = vmatmul.mubr.f32.vlgmr.msra.gmra.mxu0 %v7549_v38  ;;  %v5277_v21 = vpop.f32.mrf.mxu1 }
 0x28e   : > { %5698 = vmatprep.subr.mxu0 %v7303_v49  ;;  %5741 = vmatprep.subr.mxu1 %v7310_v14 }
 0x28f   : > { %5699 = vmatpush3.msra.mxu0 %v7303_v49  ;;  %5730 = vmatprep.mubr.f32.mxu0 %v7323_v55  ;;  %v2445_v49 = vpop.f32.mrf.mxu0 }
 0x290   : > { %5742 = vmatpush3.msra.mxu1 %v7310_v14  ;;  %5700 = vmatprep.subr.mxu0 %v7326_v39  ;;  %v2541_v14 = vpop.f32.mrf.mxu1 }
 0x291   : > { %5743 = vmatprep.subr.mxu1 %v7335_v3  ;;  %5701 = vmatpush3.msra.mxu0 %v7326_v39 }
 0x292   : > { %5744 = vmatpush3.msra.mxu1 %v7335_v3  ;;  %5702 = vmatprep.subr.mxu0 %v7343_v26 }
 0x293   : > { %5745 = vmatprep.subr.mxu1 %v7348_v33  ;;  %5703 = vmatpush3.msra.mxu0 %v7343_v26 }
 0x294   : > { %5746 = vmatpush3.msra.mxu1 %v7348_v33  ;;  %5704 = vmatprep.subr.mxu0 %v7357_v19 }
 0x295   : > { %5747 = vmatprep.subr.mxu1 %v7363_v24  ;;  %5705 = vmatpush3.msra.mxu0 %v7357_v19  ;;  %v2342_v19 = vadd.f32 %v5207_v25, %v5172_v27 }
 0x296   : > { %5748 = vmatpush3.msra.mxu1 %v7363_v24  ;;  %5706 = vmatprep.subr.mxu0 %v7378_v1  ;;  %v2336_v24 = vadd.f32 %v2335_v20, %v2174_v45  ;;  %v4289_v20 = vld [vmem:[%s7721_s4] ss:$0 sm:$0xff] }
 0x297   : > { %5749 = vmatprep.subr.mxu1 %v7388_v16  ;;  %5707 = vmatpush3.msra.mxu0 %v7378_v1  ;;  %v2453_v7 = vadd.f32 %v5242_v42, %v2342_v19 }
 0x298   : > { %5750 = vmatpush3.msra.mxu1 %v7388_v16  ;;  %5708 = vmatprep.subr.mxu0 %v7403_v0  ;;  %v2446_v16 = vadd.f32 %v2445_v49, %v2336_v24 }
 0x299   : > { %5751 = vmatprep.subr.mxu1 %v7405_v18  ;;  %5709 = vmatpush3.msra.mxu0 %v7403_v0  ;;  %v2550_v0 = vadd.f32 %v5277_v21, %v2453_v7 }
 0x29a   : > { %5752 = vmatpush3.msra.mxu1 %v7405_v18  ;;  %5710 = vmatprep.subr.mxu0 %v7411_v62  ;;  %v2542_v37 = vadd.f32 %v2541_v14, %v2446_v16 }
 0x29b   : > { %5753 = vmatprep.subr.mxu1 %v7421_v36  ;;  %5711 = vmatpush3.msra.mxu0 %v7411_v62  ;;  %v5347_v55 = vpop.f32.mrf.mxu1 }
 0x29c   : > { %5754 = vmatpush3.msra.mxu1 %v7421_v36  ;;  %5712 = vmatprep.subr.mxu0 %v7428_v43 }
 0x29d   : > { %5755 = vmatprep.subr.mxu1 %v7439_v53  ;;  %5713 = vmatpush3.msra.mxu0 %v7428_v43  ;;  %v2761_v3 = vpop.f32.mrf.mxu1 }
 0x29e   : > { %5756 = vmatpush3.msra.mxu1 %v7439_v53  ;;  %5714 = vmatprep.subr.mxu0 %v7449_v9 }
 0x29f   : > { %5757 = vmatprep.subr.mxu1 %v7454_v41  ;;  %5715 = vmatpush3.msra.mxu0 %v7449_v9 }
 0x2a0   : > { %5758 = vmatpush3.msra.mxu1 %v7454_v41  ;;  %5716 = vmatprep.subr.mxu0 %v7464_v29 }
 0x2a1   : > { %5759 = vmatprep.subr.mxu1 %v7469_v30  ;;  %5717 = vmatpush3.msra.mxu0 %v7464_v29 }
 0x2a2   : > { %5760 = vmatpush3.msra.mxu1 %v7469_v30  ;;  %5718 = vmatprep.subr.mxu0 %v7479_v32 }
 0x2a3   : > { %5761 = vmatprep.subr.mxu1 %v7484_v59  ;;  %5719 = vmatpush3.msra.mxu0 %v7479_v32  ;;  %v5312_v15 = vpop.f32.mrf.mxu0 }
 0x2a4   : > { %5762 = vmatpush3.msra.mxu1 %v7484_v59  ;;  %5720 = vmatprep.subr.mxu0 %v7491_v23  ;;  %v2675_v62 = vadd.f32 %v5312_v15, %v2550_v0 }
 0x2a5   : > { %5763 = vmatprep.subr.mxu1 %v7496_v8  ;;  %5721 = vmatpush3.msra.mxu0 %v7491_v23  ;;  %v2668_v39 = vpop.f32.mrf.mxu0 }
 0x2a6   : > { %5764 = vmatpush3.msra.mxu1 %v7496_v8  ;;  %5722 = vmatprep.subr.mxu0 %v7503_v61  ;;  %v2669_v2 = vadd.f32 %v2668_v39, %v2542_v37  ;;  %v2768_v9 = vadd.f32 %v5347_v55, %v2675_v62 }
 0x2a7   : > { %5766 = vmatmul.mubr.f32.vlgmr.msra.gmra.mxu1 %v7541_v47  ;;  %5723 = vmatpush3.msra.mxu0 %v7503_v61 }
 0x2a8   : > { %5724 = vmatprep.subr.mxu0 %v7513_v63  ;;  %v2762_v29 = vadd.f32 %v2761_v3, %v2669_v2 }
 0x2a9   : > { %5725 = vmatpush3.msra.mxu0 %v7513_v63 }
 0x2aa   : > { %5726 = vmatprep.subr.mxu0 %v7523_v48 }
 0x2ab   : > { %5727 = vmatpush3.msra.mxu0 %v7523_v48 }
 0x2ac   : > { %5728 = vmatprep.subr.mxu0 %v7530_v51 }
 0x2ad   : > { %5729 = vmatpush3.msra.mxu0 %v7530_v51 }
 0x2ae   : > { %5731 = vmatmul.mubr.f32.vlgmr.msra.gmra.mxu0 %v7541_v47 }
 0x2bd   : > { %v5417_v26 = vpop.f32.mrf.mxu1 }
 0x2bf   : > { %v3019_v12 = vpop.f32.mrf.mxu1 }
 0x2c5   : > { %v5382_v54 = vpop.f32.mrf.mxu0 }
 0x2c6   : > { %v2869_v41 = vadd.f32 %v5382_v54, %v2768_v9  ;;  %v5831_v54 = vmov 0.0  }
 0x2c7   : > { %v2858_v4 = vpop.f32.mrf.mxu0  ;;  %4176 = vst [vmem:[%s241_s24 + $0xc] sm:$0xf] %v5831_v54 }
 0x2c8   : > { %v2859_v32 = vadd.f32 %v2858_v4, %v2762_v29  ;;  %v3026_v59 = vadd.f32 %v5417_v26, %v2869_v41 }
 0x2ca   : > { %v3020_v8 = vadd.f32 %v3019_v12, %v2859_v32 }
 0x2df   : > { %v5487_v1 = vpop.f32.mrf.mxu1 }
 0x2e1   : > { %v3225_v18 = vpop.f32.mrf.mxu1 }
 0x2e7   : > { %v5452_v33 = vpop.f32.mrf.mxu0 }
 0x2e8   : > { %v3137_v17 = vadd.f32 %v5452_v33, %v3026_v59 }
 0x2e9   : > { %v3129_v57 = vpop.f32.mrf.mxu0 }
 0x2ea   : > { %v3130_v31 = vadd.f32 %v3129_v57, %v3020_v8  ;;  %v3234_v10 = vadd.f32 %v5487_v1, %v3137_v17 }
 0x2ec   : > { %v3226_v28 = vadd.f32 %v3225_v18, %v3130_v31 }
 0x301   : > { %v5557_v36 = vpop.f32.mrf.mxu1 }
 0x303   : > { %v3445_v40 = vpop.f32.mrf.mxu1 }
 0x309   : > { %v5522_v35 = vpop.f32.mrf.mxu0 }
 0x30a   : > { %v3359_v11 = vadd.f32 %v5522_v35, %v3234_v10 }
 0x30b   : > { %v3352_v43 = vpop.f32.mrf.mxu0 }
 0x30c   : > { %v3353_v6 = vadd.f32 %v3352_v43, %v3226_v28  ;;  %v3452_v50 = vadd.f32 %v5557_v36, %v3359_v11 }
 0x30e   : > { %v3446_v45 = vadd.f32 %v3445_v40, %v3353_v6 }
 0x323   : > { %v5627_v60 = vpop.f32.mrf.mxu1 }
 0x325   : > { %v3725_v23 = vpop.f32.mrf.mxu1 }
 0x32b   : > { %v5592_v53 = vpop.f32.mrf.mxu0 }
 0x32c   : > { %v3732_v61 = vadd.f32 %v5627_v60, %v5592_v53 }
 0x32d   : > { %v3564_v30 = vpop.f32.mrf.mxu0 }
 0x32e   : > { %v3726_v58 = vadd.f32 %v3725_v23, %v3564_v30 }
 0x345   : > { %v5697_v5 = vpop.f32.mrf.mxu1 }
 0x347   : > { %v3931_v51 = vpop.f32.mrf.mxu1 }
 0x34d   : > { %v5662_v46 = vpop.f32.mrf.mxu0 }
 0x34e   : > { %v3843_v48 = vadd.f32 %v5662_v46, %v3732_v61 }
 0x34f   : > { %v3835_v63 = vpop.f32.mrf.mxu0 }
 0x350   : > { %v3836_v52 = vadd.f32 %v3835_v63, %v3726_v58  ;;  %v3940_v34 = vadd.f32 %v5697_v5, %v3843_v48 }
 0x352   : > { %v3932_v38 = vadd.f32 %v3931_v51, %v3836_v52 }
 0x367   : > { %v5767_v13 = vpop.f32.mrf.mxu1 }
 0x369   : > { %v4151_v25 = vpop.f32.mrf.mxu1 }
 0x36e   : > { %v5732_v47 = vpop.f32.mrf.mxu0 }
 0x36f   : > { %v4065_v56 = vadd.f32 %v5732_v47, %v3940_v34 }
 0x370   : > { %v4058_v44 = vpop.f32.mrf.mxu0 }
 0x371   : > { %v4158_v22 = vadd.f32 %v5767_v13, %v4065_v56  ;;  %v4059_v27 = vadd.f32 %v4058_v44, %v3932_v38 }
 0x373   : > { %v4162_v42 = vadd.f32 %v4158_v22, %v3452_v50  ;;  %v4152_v21 = vadd.f32 %v4151_v25, %v4059_v27 }
 0x375   : > { %v4161_v49 = vadd.f32 %v4152_v21, %v3446_v45  ;;  %v4171_v15 = vadd.f32 %v4289_v20, %v4162_v42 }
 0x377   : > { %v4170_v14 = vadd.f32 %v4289_v20, %v4161_v49  ;;  %v4173_v39 = vmax.f32 %v4171_v15, 0.0 }
 0x379   : > { %v4172_v55 = vmax.f32 %v4170_v14, 0.0  ;;  %4175 = vst [vmem:[%s241_s24 + $0x8] sm:$0xf] %v4173_v39 }
 0x37b   : > { %4174 = vst [vmem:[%s241_s24] sm:$0xff] %v4172_v55 }
 0x37c PF: > { %s16_s18 = sadd.s32 1, %s5826_s18  }
 0x37d   : > { %p13_p1 = scmp.ge.s32.totalorder %s16_s18, 4  }
 0x37f   :  { %15 = sbr.rel (!%p13_p1) target bundleno = 1 (0x1), region = 79 }
 0x384   :  { %4199 = vsyncpa [#allocation3], 1 }
 0x385   :  { %4201 = vsyncpa [#allocation3 + $0x1], 1 }

</bundles_post_ra>
